<compile_context>
chip_gen: v7x
topology: tpu7x:2x2x1
jax: 0.10.0
libtpu: 0.0.40
codegen_flags: <defaults>
</compile_context>

<pallas_src>
import functools

import jax
import jax.numpy as jnp
from jax.experimental import pallas as pl
from jax.experimental.pallas import tpu as pltpu


# ----------------------------------------------------------------------------
# Shared GEMM (+bias, optional fused ReLU) kernel: row-tiled, "parallel" grid.
# Used for (a) the hoisted input projection X @ W_ih and (b) fc(relu(.)).
# ----------------------------------------------------------------------------
def _gemm_bias_kernel(x_ref, w_ref, b_ref, o_ref, *, apply_relu):
    x = x_ref[...]
    if apply_relu:
        x = jnp.maximum(x, 0.0)
    acc = jnp.dot(x.astype(w_ref.dtype), w_ref[...],
                  preferred_element_type=jnp.float32)
    o_ref[...] = (acc + b_ref[...].astype(jnp.float32)).astype(o_ref.dtype)


def _pick_row_tile(n, k, m, cap=512, budget_bytes=16 << 20):
    """Largest row tile (multiple of 8, <= cap) whose double-buffered in/out
    blocks fit a conservative VMEM budget."""
    if n <= cap:
        return n                       # full extent -> single block per call
    tile = cap
    while tile > 64 and tile * (k + m) * 4 * 2 > budget_bytes:
        tile //= 2
    return max(8, (tile // 8) * 8)


def gemm_bias(x2d, w, b, *, apply_relu=False):
    """x2d: (N, K), w: (K, M), b: (1, M) -> (N, M) float32."""
    n, k = x2d.shape
    m = w.shape[1]
    tile = _pick_row_tile(n, k, m)
    kernel = functools.partial(_gemm_bias_kernel, apply_relu=apply_relu)
    return pl.pallas_call(
        kernel,
        out_shape=jax.ShapeDtypeStruct((n, m), jnp.float32),
        grid_spec=pltpu.PrefetchScalarGridSpec(
            num_scalar_prefetch=0,
            grid=(pl.cdiv(n, tile),),
            in_specs=[
                pl.BlockSpec((tile, k), lambda i: (i, 0)),   # activation rows
                pl.BlockSpec((k, m), lambda i: (0, 0)),      # weight (resident)
                pl.BlockSpec((1, m), lambda i: (0, 0)),      # bias (resident)
            ],
            out_specs=pl.BlockSpec((tile, m), lambda i: (i, 0)),
        ),
        compiler_params=pltpu.CompilerParams(
            dimension_semantics=("parallel",)),              # rows independent
    )(x2d, w, b)


# ----------------------------------------------------------------------------
# GRU recurrence kernel: grid over time CHUNKS (sequential), in-kernel loop
# over the steps of a chunk.  Hidden state carried in a VMEM scratch buffer.
# Per step only ONE matmul remains: h_{t-1} @ W_hh -> (B, 3H).
# ----------------------------------------------------------------------------
def _gru_recurrence_kernel(gi_ref, h0_ref, whh_ref, bhn_ref,
                           out_ref, hlast_ref, h_scr,
                           *, hidden_dim, seq_len, time_chunk):
    c = pl.program_id(0)
    H = hidden_dim
    B = h0_ref.shape[0]

    @pl.when(c == 0)
    def _init():
        h_scr[...] = h0_ref[...].astype(jnp.float32)

    whh = whh_ref[...]                                           # (H, 3H)
    # Hoist the n-gate hidden-bias broadcast out of the time loop.
    bhn = jnp.broadcast_to(bhn_ref[...].astype(jnp.float32), (B, H))

    def step(t):
        h_prev = h_scr[...]                                      # (B, H) f32
        gi = gi_ref[t].astype(jnp.float32)                       # (B, 3H)
        gh = jnp.dot(h_prev.astype(whh.dtype), whh,
                     preferred_element_type=jnp.float32)         # (B, 3H)
        rz = jax.nn.sigmoid(gi[:, :2 * H] + gh[:, :2 * H])       # one EUP slab
        r = rz[:, :H]
        z = rz[:, H:]
        n = jnp.tanh(gi[:, 2 * H:] + r * (gh[:, 2 * H:] + bhn))
        h_new = n + z * (h_prev - n)                             # == (1-z)n + z h
        h_scr[...] = h_new
        out_ref[t] = h_new.astype(out_ref.dtype)

    divisible = (seq_len % time_chunk == 0)
    if divisible and time_chunk <= 16:
        # Short static chunk: fully unroll (static indices, best scheduling).
        for t in range(time_chunk):
            step(t)
    else:
        if divisible:
            n_valid = time_chunk                                 # static bound
        else:
            n_valid = jnp.minimum(time_chunk, seq_len - c * time_chunk)
        pl.loop(0, n_valid)(step)

    # h_last only needs to be stored once, on the final chunk.
    @pl.when(c == pl.num_programs(0) - 1)
    def _final():
        hlast_ref[...] = h_scr[...].astype(hlast_ref.dtype)


def _pick_time_chunk(T, B, H, cap=128, budget_bytes=20 << 20):
    """Chunk length whose double-buffered GI-in + out blocks fit the budget."""
    per_step = B * (3 * H + H) * 4 * 2                # f32, x2 double-buffer
    tc = max(1, min(cap, T, budget_bytes // max(per_step, 1)))
    return int(tc)


def gru_recurrence(gi_tm, h0_layer, w_hh, b_hn, *, time_chunk):
    """gi_tm: (T, B, 3H) precomputed input projections (biases pre-folded),
    h0_layer: (B, H), w_hh: (H, 3H), b_hn: (1, H).
    Returns (out_tm: (T, B, H), h_last: (B, H))."""
    T, B, G = gi_tm.shape
    H = G // 3
    kernel = functools.partial(_gru_recurrence_kernel,
                               hidden_dim=H, seq_len=T, time_chunk=time_chunk)
    out_tm, h_last = pl.pallas_call(
        kernel,
        out_shape=(jax.ShapeDtypeStruct((T, B, H), jnp.float32),
                   jax.ShapeDtypeStruct((B, H), jnp.float32)),
        grid_spec=pltpu.PrefetchScalarGridSpec(
            num_scalar_prefetch=0,
            grid=(pl.cdiv(T, time_chunk),),
            in_specs=[
                pl.BlockSpec((time_chunk, B, G), lambda c: (c, 0, 0)),  # GI chunk
                pl.BlockSpec((B, H), lambda c: (0, 0)),                 # h0
                pl.BlockSpec((H, G), lambda c: (0, 0)),                 # W_hh resident
                pl.BlockSpec((1, H), lambda c: (0, 0)),                 # b_hn
            ],
            out_specs=(pl.BlockSpec((time_chunk, B, H), lambda c: (c, 0, 0)),
                       pl.BlockSpec((B, H), lambda c: (0, 0))),
            scratch_shapes=[pltpu.VMEM((B, H), jnp.float32)],           # hidden state
        ),
        compiler_params=pltpu.CompilerParams(
            dimension_semantics=("arbitrary",)),   # recurrence => sequential
    )(gi_tm, h0_layer, w_hh, b_hn)
    return out_tm, h_last


# ----------------------------------------------------------------------------
# Parameter init (deterministic, PyTorch-style U(-1/sqrt(H), 1/sqrt(H))),
# stored directly in the fused/folded layout used by the kernels.
# ----------------------------------------------------------------------------
def init_params(key, input_dim, hidden_dim, output_dim, n_layers):
    H = hidden_dim
    k = 1.0 / jnp.sqrt(jnp.float32(H))
    layers = []
    for layer in range(n_layers):
        d_in = input_dim if layer == 0 else H
        key, k1, k2, k3, k4 = jax.random.split(key, 5)
        w_ih = jax.random.uniform(k1, (d_in, 3 * H), jnp.float32, -k, k)
        w_hh = jax.random.uniform(k2, (H, 3 * H), jnp.float32, -k, k)
        b_ih = jax.random.uniform(k3, (1, 3 * H), jnp.float32, -k, k)
        b_hh = jax.random.uniform(k4, (1, 3 * H), jnp.float32, -k, k)
        # Fold b_hr, b_hz into the input-projection bias; keep b_hn on the
        # recurrent path since it is multiplied by r_t.
        b_gi = b_ih + jnp.concatenate(
            [b_hh[:, :2 * H], jnp.zeros((1, H), jnp.float32)], axis=1)  # (1, 3H)
        b_hn = b_hh[:, 2 * H:]                                          # (1, H)
        layers.append((w_ih, w_hh, b_gi, b_hn))
    key, k5, k6 = jax.random.split(key, 3)
    w_fc = jax.random.uniform(k5, (H, output_dim), jnp.float32, -k, k)  # (H, O)
    b_fc = jax.random.uniform(k6, (1, output_dim), jnp.float32, -k, k)
    return {"gru": layers, "fc": (w_fc, b_fc)}


# ----------------------------------------------------------------------------
# Full GRUNet forward.
# ----------------------------------------------------------------------------
def _forward_impl(x, h0, params, *, compute_dtype):
    B, T, _ = x.shape
    H = params["gru"][0][1].shape[0]          # w_hh: (H, 3H)
    out_dim = params["fc"][0].shape[1]

    # Pad batch to a multiple of 8 sublanes (removes masked partial-vreg stores).
    B_pad = ((B + 7) // 8) * 8
    if B_pad != B:
        x = jnp.pad(x, ((0, B_pad - B), (0, 0), (0, 0)))
        h0 = jnp.pad(h0, ((0, 0), (0, B_pad - B), (0, 0)))

    # Time-major so each recurrence step reads a contiguous (B, .) slab.
    layer_in_tm = jnp.transpose(x, (1, 0, 2)).astype(jnp.float32)  # (T, B_pad, D)
    time_chunk = _pick_time_chunk(T, B_pad, H)

    h_finals = []
    for layer, (w_ih, w_hh, b_gi, b_hn) in enumerate(params["gru"]):
        d_in = w_ih.shape[0]
        # Hoisted input projection for the whole sequence: one lane-dense GEMM.
        gi2d = gemm_bias(layer_in_tm.reshape(T * B_pad, d_in),
                         w_ih.astype(compute_dtype), b_gi, apply_relu=False)
        gi_tm = gi2d.reshape(T, B_pad, 3 * H)
        layer_in_tm, h_last = gru_recurrence(
            gi_tm, h0[layer], w_hh.astype(compute_dtype), b_hn,
            time_chunk=time_chunk)
        h_finals.append(h_last)

    h_out = jnp.stack(h_finals, axis=0)[:, :B, :]                  # (L, B, H)

    # fc(relu(.)) head: pad the output dim to 128 lanes for unmasked stores.
    w_fc, b_fc = params["fc"]
    o_pad = ((out_dim + 127) // 128) * 128
    w_fc_p = jnp.pad(w_fc, ((0, 0), (0, o_pad - out_dim))).astype(compute_dtype)
    b_fc_p = jnp.pad(b_fc, ((0, 0), (0, o_pad - out_dim)))
    out2d = gemm_bias(layer_in_tm.reshape(T * B_pad, H), w_fc_p, b_fc_p,
                      apply_relu=True)                             # (T*B_pad, o_pad)
    out = jnp.transpose(out2d.reshape(T, B_pad, o_pad), (1, 0, 2))[:B, :, :out_dim]
    return out, h_out


@jax.jit
def grunet_forward(x, h0, params):
    """x: (B, T, input_dim), h0: (n_layers, B, H).
    Returns (out: (B, T, output_dim), h: (n_layers, B, H))."""
    # compute_dtype=jnp.bfloat16 is the recommended setting on v6e/v7x
    # (f32 accumulation is kept); default f32 matches PyTorch numerics.
    return _forward_impl(x, h0, params, compute_dtype=jnp.float32)


if __name__ == "__main__":
    # Small shapes consistent with the module's forward signature.
    B, T = 2, 8
    input_dim, hidden_dim, output_dim, n_layers = 4, 32, 3, 2

    key = jax.random.PRNGKey(0)
    key, kx = jax.random.split(key)
    x = jax.random.normal(kx, (B, T, input_dim), jnp.float32)
    h0 = jnp.zeros((n_layers, B, hidden_dim), jnp.float32)        # init_hidden(B)

    params = init_params(jax.random.PRNGKey(0), input_dim, hidden_dim,
                         output_dim, n_layers)

    out, h = grunet_forward(x, h0, params)
    jax.block_until_ready((out, h))

    assert out.shape == (B, T, output_dim), out.shape
    assert h.shape == (n_layers, B, hidden_dim), h.shape
    assert bool(jnp.all(jnp.isfinite(out))) and bool(jnp.all(jnp.isfinite(h)))
    print("KERNEL_OK")
</pallas_src>

<mosaic_0001>
module attributes {stable_mosaic.version = 11 : i64} {
  func.func @_gemm_bias_kernel(%arg0: i32, %arg1: memref<64x4xf32, #tpu.memory_space<vmem>>, %arg2: memref<4x96xf32, #tpu.memory_space<vmem>>, %arg3: memref<1x96xf32, #tpu.memory_space<vmem>>, %arg4: memref<64x96xf32, #tpu.memory_space<vmem>>) attributes {dimension_semantics = [#tpu.dimension_semantics<parallel>], iteration_bounds = array<i64: 1>, scalar_prefetch = 0 : i64, scratch_operands = 0 : i64, tpu.core_type = #tpu.core_type<tc>, window_params = [{transform_indices = @transform_0, window_bounds = array<i64: 64, 4>}, {pipeline_mode = #tpu.pipeline_mode<synchronous>, transform_indices = @transform_1, window_bounds = array<i64: 4, 96>}, {pipeline_mode = #tpu.pipeline_mode<synchronous>, transform_indices = @transform_2, window_bounds = array<i64: 1, 96>}, {transform_indices = @transform_3, window_bounds = array<i64: 64, 96>}]} {
    %c0 = arith.constant 0 : index
    %c0_0 = arith.constant 0 : index
    %0 = vector.load %arg1[%c0, %c0_0] : memref<64x4xf32, #tpu.memory_space<vmem>>, vector<64x4xf32>
    %c0_1 = arith.constant 0 : index
    %c0_2 = arith.constant 0 : index
    %1 = vector.load %arg2[%c0_1, %c0_2] : memref<4x96xf32, #tpu.memory_space<vmem>>, vector<4x96xf32>
    %cst = arith.constant dense<0.000000e+00> : vector<64x96xf32>
    %2 = tpu.matmul %0, %1, %cst {dimension_numbers = #tpu.dot_dimension_numbers<[1], [0], [0], [1], [0, 0, 1, 1], [], []>} : vector<64x4xf32>, vector<4x96xf32>, vector<64x96xf32> -> vector<64x96xf32>
    %c0_3 = arith.constant 0 : index
    %c0_4 = arith.constant 0 : index
    %3 = vector.load %arg3[%c0_3, %c0_4] : memref<1x96xf32, #tpu.memory_space<vmem>>, vector<1x96xf32>
    %4 = vector.broadcast %3 : vector<1x96xf32> to vector<64x96xf32>
    %5 = arith.addf %2, %4 : vector<64x96xf32>
    %c0_5 = arith.constant 0 : index
    %c0_6 = arith.constant 0 : index
    %6 = vector.load %arg4[%c0_5, %c0_6] : memref<64x96xf32, #tpu.memory_space<vmem>>, vector<64x96xf32>
    tpu.vector_store %arg4[%c0_5, %c0_6], %5 {strides = array<i32>} : memref<64x96xf32, #tpu.memory_space<vmem>>, vector<64x96xf32>,
    return
  }
  func.func @transform_0(%arg0: i32) -> (i32, i32) {
    %c0_i32 = arith.constant 0 : i32
    %c0_i32_0 = arith.constant 0 : i32
    return %arg0, %c0_i32 : i32, i32
  }
  func.func @transform_1(%arg0: i32) -> (i32, i32) {
    %c0_i32 = arith.constant 0 : i32
    %c0_i32_0 = arith.constant 0 : i32
    %c0_i32_1 = arith.constant 0 : i32
    return %c0_i32, %c0_i32_0 : i32, i32
  }
  func.func @transform_2(%arg0: i32) -> (i32, i32) {
    %c0_i32 = arith.constant 0 : i32
    %c0_i32_0 = arith.constant 0 : i32
    %c0_i32_1 = arith.constant 0 : i32
    return %c0_i32, %c0_i32_0 : i32, i32
  }
  func.func @transform_3(%arg0: i32) -> (i32, i32) {
    %c0_i32 = arith.constant 0 : i32
    %c0_i32_0 = arith.constant 0 : i32
    return %arg0, %c0_i32 : i32, i32
  }
}

module attributes {stable_mosaic.version = 11 : i64} {
  func.func @_gemm_bias_kernel(%arg0: i32, %arg1: memref<64x32xf32, #tpu.memory_space<vmem>>, %arg2: memref<32x96xf32, #tpu.memory_space<vmem>>, %arg3: memref<1x96xf32, #tpu.memory_space<vmem>>, %arg4: memref<64x96xf32, #tpu.memory_space<vmem>>) attributes {dimension_semantics = [#tpu.dimension_semantics<parallel>], iteration_bounds = array<i64: 1>, scalar_prefetch = 0 : i64, scratch_operands = 0 : i64, tpu.core_type = #tpu.core_type<tc>, window_params = [{transform_indices = @transform_0, window_bounds = array<i64: 64, 32>}, {pipeline_mode = #tpu.pipeline_mode<synchronous>, transform_indices = @transform_1, window_bounds = array<i64: 32, 96>}, {pipeline_mode = #tpu.pipeline_mode<synchronous>, transform_indices = @transform_2, window_bounds = array<i64: 1, 96>}, {transform_indices = @transform_3, window_bounds = array<i64: 64, 96>}]} {
    %c0 = arith.constant 0 : index
    %c0_0 = arith.constant 0 : index
    %0 = vector.load %arg1[%c0, %c0_0] : memref<64x32xf32, #tpu.memory_space<vmem>>, vector<64x32xf32>
    %c0_1 = arith.constant 0 : index
    %c0_2 = arith.constant 0 : index
    %1 = vector.load %arg2[%c0_1, %c0_2] : memref<32x96xf32, #tpu.memory_space<vmem>>, vector<32x96xf32>
    %cst = arith.constant dense<0.000000e+00> : vector<64x96xf32>
    %2 = tpu.matmul %0, %1, %cst {dimension_numbers = #tpu.dot_dimension_numbers<[1], [0], [0], [1], [0, 0, 1, 1], [], []>} : vector<64x32xf32>, vector<32x96xf32>, vector<64x96xf32> -> vector<64x96xf32>
    %c0_3 = arith.constant 0 : index
    %c0_4 = arith.constant 0 : index
    %3 = vector.load %arg3[%c0_3, %c0_4] : memref<1x96xf32, #tpu.memory_space<vmem>>, vector<1x96xf32>
    %4 = vector.broadcast %3 : vector<1x96xf32> to vector<64x96xf32>
    %5 = arith.addf %2, %4 : vector<64x96xf32>
    %c0_5 = arith.constant 0 : index
    %c0_6 = arith.constant 0 : index
    %6 = vector.load %arg4[%c0_5, %c0_6] : memref<64x96xf32, #tpu.memory_space<vmem>>, vector<64x96xf32>
    tpu.vector_store %arg4[%c0_5, %c0_6], %5 {strides = array<i32>} : memref<64x96xf32, #tpu.memory_space<vmem>>, vector<64x96xf32>,
    return
  }
  func.func @transform_0(%arg0: i32) -> (i32, i32) {
    %c0_i32 = arith.constant 0 : i32
    %c0_i32_0 = arith.constant 0 : i32
    return %arg0, %c0_i32 : i32, i32
  }
  func.func @transform_1(%arg0: i32) -> (i32, i32) {
    %c0_i32 = arith.constant 0 : i32
    %c0_i32_0 = arith.constant 0 : i32
    %c0_i32_1 = arith.constant 0 : i32
    return %c0_i32, %c0_i32_0 : i32, i32
  }
  func.func @transform_2(%arg0: i32) -> (i32, i32) {
    %c0_i32 = arith.constant 0 : i32
    %c0_i32_0 = arith.constant 0 : i32
    %c0_i32_1 = arith.constant 0 : i32
    return %c0_i32, %c0_i32_0 : i32, i32
  }
  func.func @transform_3(%arg0: i32) -> (i32, i32) {
    %c0_i32 = arith.constant 0 : i32
    %c0_i32_0 = arith.constant 0 : i32
    return %arg0, %c0_i32 : i32, i32
  }
}

module attributes {stable_mosaic.version = 11 : i64} {
  func.func @_gru_recurrence_kernel(%arg0: i32, %arg1: memref<8x8x96xf32, #tpu.memory_space<vmem>>, %arg2: memref<8x32xf32, #tpu.memory_space<vmem>>, %arg3: memref<32x96xf32, #tpu.memory_space<vmem>>, %arg4: memref<1x32xf32, #tpu.memory_space<vmem>>, %arg5: memref<8x8x32xf32, #tpu.memory_space<vmem>>, %arg6: memref<8x32xf32, #tpu.memory_space<vmem>>, %arg7: memref<8x32xf32, #tpu.memory_space<vmem>>) attributes {dimension_semantics = [#tpu.dimension_semantics<arbitrary>], iteration_bounds = array<i64: 1>, scalar_prefetch = 0 : i64, scratch_operands = 1 : i64, tpu.core_type = #tpu.core_type<tc>, window_params = [{transform_indices = @transform_0, window_bounds = array<i64: 8, 8, 96>}, {pipeline_mode = #tpu.pipeline_mode<synchronous>, transform_indices = @transform_1, window_bounds = array<i64: 8, 32>}, {pipeline_mode = #tpu.pipeline_mode<synchronous>, transform_indices = @transform_2, window_bounds = array<i64: 32, 96>}, {pipeline_mode = #tpu.pipeline_mode<synchronous>, transform_indices = @transform_3, window_bounds = array<i64: 1, 32>}, {transform_indices = @transform_4, window_bounds = array<i64: 8, 8, 32>}, {pipeline_mode = #tpu.pipeline_mode<synchronous>, transform_indices = @transform_5, window_bounds = array<i64: 8, 32>}]} {
    %c0_i32 = arith.constant 0 : i32
    %0 = arith.cmpi eq, %arg0, %c0_i32 : i32
    %1 = arith.extui %0 : i1 to i32
    %c0_i32_0 = arith.constant 0 : i32
    %2 = arith.cmpi ne, %1, %c0_i32_0 : i32
    scf.if %2 {
      %c0_94 = arith.constant 0 : index
      %c0_95 = arith.constant 0 : index
      %226 = vector.load %arg2[%c0_94, %c0_95] : memref<8x32xf32, #tpu.memory_space<vmem>>, vector<8x32xf32>
      %c0_96 = arith.constant 0 : index
      %c0_97 = arith.constant 0 : index
      %227 = vector.load %arg7[%c0_96, %c0_97] : memref<8x32xf32, #tpu.memory_space<vmem>>, vector<8x32xf32>
      tpu.vector_store %arg7[%c0_96, %c0_97], %226 {strides = array<i32>} : memref<8x32xf32, #tpu.memory_space<vmem>>, vector<8x32xf32>,
    } else {
    }
    %c0 = arith.constant 0 : index
    %c0_1 = arith.constant 0 : index
    %3 = vector.load %arg3[%c0, %c0_1] : memref<32x96xf32, #tpu.memory_space<vmem>>, vector<32x96xf32>
    %c0_2 = arith.constant 0 : index
    %c0_3 = arith.constant 0 : index
    %4 = vector.load %arg4[%c0_2, %c0_3] : memref<1x32xf32, #tpu.memory_space<vmem>>, vector<1x32xf32>
    %5 = vector.shape_cast %4 : vector<1x32xf32> to vector<1x32xf32>
    %6 = vector.broadcast %5 : vector<1x32xf32> to vector<8x32xf32>
    %c0_4 = arith.constant 0 : index
    %c0_5 = arith.constant 0 : index
    %7 = vector.load %arg7[%c0_4, %c0_5] : memref<8x32xf32, #tpu.memory_space<vmem>>, vector<8x32xf32>
    %c0_6 = arith.constant 0 : index
    %c0_7 = arith.constant 0 : index
    %c0_8 = arith.constant 0 : index
    %8 = vector.load %arg1[%c0_6, %c0_7, %c0_8] : memref<8x8x96xf32, #tpu.memory_space<vmem>>, vector<1x8x96xf32>
    %9 = vector.shape_cast %8 : vector<1x8x96xf32> to vector<8x96xf32>
    %cst = arith.constant dense<0.000000e+00> : vector<8x96xf32>
    %10 = tpu.matmul %7, %3, %cst {dimension_numbers = #tpu.dot_dimension_numbers<[1], [0], [0], [1], [0, 0, 1, 1], [], []>} : vector<8x32xf32>, vector<32x96xf32>, vector<8x96xf32> -> vector<8x96xf32>
    %11 = vector.extract_strided_slice %9 {offsets = [0, 0], sizes = [8, 64], strides = [1, 1]} : vector<8x96xf32> to vector<8x64xf32>
    %12 = vector.extract_strided_slice %10 {offsets = [0, 0], sizes = [8, 64], strides = [1, 1]} : vector<8x96xf32> to vector<8x64xf32>
    %13 = arith.addf %11, %12 : vector<8x64xf32>
    %14 = arith.negf %13 : vector<8x64xf32>
    %15 = math.exp %14 : vector<8x64xf32>
    %cst_9 = arith.constant 1.000000e+00 : f32
    %16 = vector.broadcast %cst_9 : f32 to vector<8x64xf32>
    %17 = arith.addf %16, %15 : vector<8x64xf32>
    %18 = arith.divf %16, %17 : vector<8x64xf32>
    %19 = vector.extract_strided_slice %18 {offsets = [0, 0], sizes = [8, 32], strides = [1, 1]} : vector<8x64xf32> to vector<8x32xf32>
    %20 = vector.extract_strided_slice %18 {offsets = [0, 32], sizes = [8, 32], strides = [1, 1]} : vector<8x64xf32> to vector<8x32xf32>
    %21 = vector.extract_strided_slice %9 {offsets = [0, 64], sizes = [8, 32], strides = [1, 1]} : vector<8x96xf32> to vector<8x32xf32>
    %22 = vector.extract_strided_slice %10 {offsets = [0, 64], sizes = [8, 32], strides = [1, 1]} : vector<8x96xf32> to vector<8x32xf32>
    %23 = arith.addf %22, %6 : vector<8x32xf32>
    %24 = arith.mulf %19, %23 : vector<8x32xf32>
    %25 = arith.addf %21, %24 : vector<8x32xf32>
    %26 = math.tanh %25 : vector<8x32xf32>
    %27 = arith.subf %7, %26 : vector<8x32xf32>
    %28 = arith.mulf %20, %27 : vector<8x32xf32>
    %29 = arith.addf %26, %28 : vector<8x32xf32>
    %c0_10 = arith.constant 0 : index
    %c0_11 = arith.constant 0 : index
    %30 = vector.load %arg7[%c0_10, %c0_11] : memref<8x32xf32, #tpu.memory_space<vmem>>, vector<8x32xf32>
    tpu.vector_store %arg7[%c0_10, %c0_11], %29 {strides = array<i32>} : memref<8x32xf32, #tpu.memory_space<vmem>>, vector<8x32xf32>,
    %c0_12 = arith.constant 0 : index
    %c0_13 = arith.constant 0 : index
    %c0_14 = arith.constant 0 : index
    %31 = vector.load %arg5[%c0_12, %c0_13, %c0_14] : memref<8x8x32xf32, #tpu.memory_space<vmem>>, vector<1x8x32xf32>
    %32 = vector.shape_cast %31 : vector<1x8x32xf32> to vector<8x32xf32>
    %33 = vector.shape_cast %29 : vector<8x32xf32> to vector<1x8x32xf32>
    tpu.vector_store %arg5[%c0_12, %c0_13, %c0_14], %33 {strides = array<i32>} : memref<8x8x32xf32, #tpu.memory_space<vmem>>, vector<1x8x32xf32>,
    %c0_15 = arith.constant 0 : index
    %c0_16 = arith.constant 0 : index
    %34 = vector.load %arg7[%c0_15, %c0_16] : memref<8x32xf32, #tpu.memory_space<vmem>>, vector<8x32xf32>
    %c1 = arith.constant 1 : index
    %c0_17 = arith.constant 0 : index
    %c0_18 = arith.constant 0 : index
    %35 = vector.load %arg1[%c1, %c0_17, %c0_18] : memref<8x8x96xf32, #tpu.memory_space<vmem>>, vector<1x8x96xf32>
    %36 = vector.shape_cast %35 : vector<1x8x96xf32> to vector<8x96xf32>
    %cst_19 = arith.constant dense<0.000000e+00> : vector<8x96xf32>
    %37 = tpu.matmul %34, %3, %cst_19 {dimension_numbers = #tpu.dot_dimension_numbers<[1], [0], [0], [1], [0, 0, 1, 1], [], []>} : vector<8x32xf32>, vector<32x96xf32>, vector<8x96xf32> -> vector<8x96xf32>
    %38 = vector.extract_strided_slice %36 {offsets = [0, 0], sizes = [8, 64], strides = [1, 1]} : vector<8x96xf32> to vector<8x64xf32>
    %39 = vector.extract_strided_slice %37 {offsets = [0, 0], sizes = [8, 64], strides = [1, 1]} : vector<8x96xf32> to vector<8x64xf32>
    %40 = arith.addf %38, %39 : vector<8x64xf32>
    %41 = arith.negf %40 : vector<8x64xf32>
    %42 = math.exp %41 : vector<8x64xf32>
    %cst_20 = arith.constant 1.000000e+00 : f32
    %43 = vector.broadcast %cst_20 : f32 to vector<8x64xf32>
    %44 = arith.addf %43, %42 : vector<8x64xf32>
    %45 = arith.divf %43, %44 : vector<8x64xf32>
    %46 = vector.extract_strided_slice %45 {offsets = [0, 0], sizes = [8, 32], strides = [1, 1]} : vector<8x64xf32> to vector<8x32xf32>
    %47 = vector.extract_strided_slice %45 {offsets = [0, 32], sizes = [8, 32], strides = [1, 1]} : vector<8x64xf32> to vector<8x32xf32>
    %48 = vector.extract_strided_slice %36 {offsets = [0, 64], sizes = [8, 32], strides = [1, 1]} : vector<8x96xf32> to vector<8x32xf32>
    %49 = vector.extract_strided_slice %37 {offsets = [0, 64], sizes = [8, 32], strides = [1, 1]} : vector<8x96xf32> to vector<8x32xf32>
    %50 = arith.addf %49, %6 : vector<8x32xf32>
    %51 = arith.mulf %46, %50 : vector<8x32xf32>
    %52 = arith.addf %48, %51 : vector<8x32xf32>
    %53 = math.tanh %52 : vector<8x32xf32>
    %54 = arith.subf %34, %53 : vector<8x32xf32>
    %55 = arith.mulf %47, %54 : vector<8x32xf32>
    %56 = arith.addf %53, %55 : vector<8x32xf32>
    %c0_21 = arith.constant 0 : index
    %c0_22 = arith.constant 0 : index
    %57 = vector.load %arg7[%c0_21, %c0_22] : memref<8x32xf32, #tpu.memory_space<vmem>>, vector<8x32xf32>
    tpu.vector_store %arg7[%c0_21, %c0_22], %56 {strides = array<i32>} : memref<8x32xf32, #tpu.memory_space<vmem>>, vector<8x32xf32>,
    %c1_23 = arith.constant 1 : index
    %c0_24 = arith.constant 0 : index
    %c0_25 = arith.constant 0 : index
    %58 = vector.load %arg5[%c1_23, %c0_24, %c0_25] : memref<8x8x32xf32, #tpu.memory_space<vmem>>, vector<1x8x32xf32>
    %59 = vector.shape_cast %58 : vector<1x8x32xf32> to vector<8x32xf32>
    %60 = vector.shape_cast %56 : vector<8x32xf32> to vector<1x8x32xf32>
    tpu.vector_store %arg5[%c1_23, %c0_24, %c0_25], %60 {strides = array<i32>} : memref<8x8x32xf32, #tpu.memory_space<vmem>>, vector<1x8x32xf32>,
    %c0_26 = arith.constant 0 : index
    %c0_27 = arith.constant 0 : index
    %61 = vector.load %arg7[%c0_26, %c0_27] : memref<8x32xf32, #tpu.memory_space<vmem>>, vector<8x32xf32>
    %c2 = arith.constant 2 : index
    %c0_28 = arith.constant 0 : index
    %c0_29 = arith.constant 0 : index
    %62 = vector.load %arg1[%c2, %c0_28, %c0_29] : memref<8x8x96xf32, #tpu.memory_space<vmem>>, vector<1x8x96xf32>
    %63 = vector.shape_cast %62 : vector<1x8x96xf32> to vector<8x96xf32>
    %cst_30 = arith.constant dense<0.000000e+00> : vector<8x96xf32>
    %64 = tpu.matmul %61, %3, %cst_30 {dimension_numbers = #tpu.dot_dimension_numbers<[1], [0], [0], [1], [0, 0, 1, 1], [], []>} : vector<8x32xf32>, vector<32x96xf32>, vector<8x96xf32> -> vector<8x96xf32>
    %65 = vector.extract_strided_slice %63 {offsets = [0, 0], sizes = [8, 64], strides = [1, 1]} : vector<8x96xf32> to vector<8x64xf32>
    %66 = vector.extract_strided_slice %64 {offsets = [0, 0], sizes = [8, 64], strides = [1, 1]} : vector<8x96xf32> to vector<8x64xf32>
    %67 = arith.addf %65, %66 : vector<8x64xf32>
    %68 = arith.negf %67 : vector<8x64xf32>
    %69 = math.exp %68 : vector<8x64xf32>
    %cst_31 = arith.constant 1.000000e+00 : f32
    %70 = vector.broadcast %cst_31 : f32 to vector<8x64xf32>
    %71 = arith.addf %70, %69 : vector<8x64xf32>
    %72 = arith.divf %70, %71 : vector<8x64xf32>
    %73 = vector.extract_strided_slice %72 {offsets = [0, 0], sizes = [8, 32], strides = [1, 1]} : vector<8x64xf32> to vector<8x32xf32>
    %74 = vector.extract_strided_slice %72 {offsets = [0, 32], sizes = [8, 32], strides = [1, 1]} : vector<8x64xf32> to vector<8x32xf32>
    %75 = vector.extract_strided_slice %63 {offsets = [0, 64], sizes = [8, 32], strides = [1, 1]} : vector<8x96xf32> to vector<8x32xf32>
    %76 = vector.extract_strided_slice %64 {offsets = [0, 64], sizes = [8, 32], strides = [1, 1]} : vector<8x96xf32> to vector<8x32xf32>
    %77 = arith.addf %76, %6 : vector<8x32xf32>
    %78 = arith.mulf %73, %77 : vector<8x32xf32>
    %79 = arith.addf %75, %78 : vector<8x32xf32>
    %80 = math.tanh %79 : vector<8x32xf32>
    %81 = arith.subf %61, %80 : vector<8x32xf32>
    %82 = arith.mulf %74, %81 : vector<8x32xf32>
    %83 = arith.addf %80, %82 : vector<8x32xf32>
    %c0_32 = arith.constant 0 : index
    %c0_33 = arith.constant 0 : index
    %84 = vector.load %arg7[%c0_32, %c0_33] : memref<8x32xf32, #tpu.memory_space<vmem>>, vector<8x32xf32>
    tpu.vector_store %arg7[%c0_32, %c0_33], %83 {strides = array<i32>} : memref<8x32xf32, #tpu.memory_space<vmem>>, vector<8x32xf32>,
    %c2_34 = arith.constant 2 : index
    %c0_35 = arith.constant 0 : index
    %c0_36 = arith.constant 0 : index
    %85 = vector.load %arg5[%c2_34, %c0_35, %c0_36] : memref<8x8x32xf32, #tpu.memory_space<vmem>>, vector<1x8x32xf32>
    %86 = vector.shape_cast %85 : vector<1x8x32xf32> to vector<8x32xf32>
    %87 = vector.shape_cast %83 : vector<8x32xf32> to vector<1x8x32xf32>
    tpu.vector_store %arg5[%c2_34, %c0_35, %c0_36], %87 {strides = array<i32>} : memref<8x8x32xf32, #tpu.memory_space<vmem>>, vector<1x8x32xf32>,
    %c0_37 = arith.constant 0 : index
    %c0_38 = arith.constant 0 : index
    %88 = vector.load %arg7[%c0_37, %c0_38] : memref<8x32xf32, #tpu.memory_space<vmem>>, vector<8x32xf32>
    %c3 = arith.constant 3 : index
    %c0_39 = arith.constant 0 : index
    %c0_40 = arith.constant 0 : index
    %89 = vector.load %arg1[%c3, %c0_39, %c0_40] : memref<8x8x96xf32, #tpu.memory_space<vmem>>, vector<1x8x96xf32>
    %90 = vector.shape_cast %89 : vector<1x8x96xf32> to vector<8x96xf32>
    %cst_41 = arith.constant dense<0.000000e+00> : vector<8x96xf32>
    %91 = tpu.matmul %88, %3, %cst_41 {dimension_numbers = #tpu.dot_dimension_numbers<[1], [0], [0], [1], [0, 0, 1, 1], [], []>} : vector<8x32xf32>, vector<32x96xf32>, vector<8x96xf32> -> vector<8x96xf32>
    %92 = vector.extract_strided_slice %90 {offsets = [0, 0], sizes = [8, 64], strides = [1, 1]} : vector<8x96xf32> to vector<8x64xf32>
    %93 = vector.extract_strided_slice %91 {offsets = [0, 0], sizes = [8, 64], strides = [1, 1]} : vector<8x96xf32> to vector<8x64xf32>
    %94 = arith.addf %92, %93 : vector<8x64xf32>
    %95 = arith.negf %94 : vector<8x64xf32>
    %96 = math.exp %95 : vector<8x64xf32>
    %cst_42 = arith.constant 1.000000e+00 : f32
    %97 = vector.broadcast %cst_42 : f32 to vector<8x64xf32>
    %98 = arith.addf %97, %96 : vector<8x64xf32>
    %99 = arith.divf %97, %98 : vector<8x64xf32>
    %100 = vector.extract_strided_slice %99 {offsets = [0, 0], sizes = [8, 32], strides = [1, 1]} : vector<8x64xf32> to vector<8x32xf32>
    %101 = vector.extract_strided_slice %99 {offsets = [0, 32], sizes = [8, 32], strides = [1, 1]} : vector<8x64xf32> to vector<8x32xf32>
    %102 = vector.extract_strided_slice %90 {offsets = [0, 64], sizes = [8, 32], strides = [1, 1]} : vector<8x96xf32> to vector<8x32xf32>
    %103 = vector.extract_strided_slice %91 {offsets = [0, 64], sizes = [8, 32], strides = [1, 1]} : vector<8x96xf32> to vector<8x32xf32>
    %104 = arith.addf %103, %6 : vector<8x32xf32>
    %105 = arith.mulf %100, %104 : vector<8x32xf32>
    %106 = arith.addf %102, %105 : vector<8x32xf32>
    %107 = math.tanh %106 : vector<8x32xf32>
    %108 = arith.subf %88, %107 : vector<8x32xf32>
    %109 = arith.mulf %101, %108 : vector<8x32xf32>
    %110 = arith.addf %107, %109 : vector<8x32xf32>
    %c0_43 = arith.constant 0 : index
    %c0_44 = arith.constant 0 : index
    %111 = vector.load %arg7[%c0_43, %c0_44] : memref<8x32xf32, #tpu.memory_space<vmem>>, vector<8x32xf32>
    tpu.vector_store %arg7[%c0_43, %c0_44], %110 {strides = array<i32>} : memref<8x32xf32, #tpu.memory_space<vmem>>, vector<8x32xf32>,
    %c3_45 = arith.constant 3 : index
    %c0_46 = arith.constant 0 : index
    %c0_47 = arith.constant 0 : index
    %112 = vector.load %arg5[%c3_45, %c0_46, %c0_47] : memref<8x8x32xf32, #tpu.memory_space<vmem>>, vector<1x8x32xf32>
    %113 = vector.shape_cast %112 : vector<1x8x32xf32> to vector<8x32xf32>
    %114 = vector.shape_cast %110 : vector<8x32xf32> to vector<1x8x32xf32>
    tpu.vector_store %arg5[%c3_45, %c0_46, %c0_47], %114 {strides = array<i32>} : memref<8x8x32xf32, #tpu.memory_space<vmem>>, vector<1x8x32xf32>,
    %c0_48 = arith.constant 0 : index
    %c0_49 = arith.constant 0 : index
    %115 = vector.load %arg7[%c0_48, %c0_49] : memref<8x32xf32, #tpu.memory_space<vmem>>, vector<8x32xf32>
    %c4 = arith.constant 4 : index
    %c0_50 = arith.constant 0 : index
    %c0_51 = arith.constant 0 : index
    %116 = vector.load %arg1[%c4, %c0_50, %c0_51] : memref<8x8x96xf32, #tpu.memory_space<vmem>>, vector<1x8x96xf32>
    %117 = vector.shape_cast %116 : vector<1x8x96xf32> to vector<8x96xf32>
    %cst_52 = arith.constant dense<0.000000e+00> : vector<8x96xf32>
    %118 = tpu.matmul %115, %3, %cst_52 {dimension_numbers = #tpu.dot_dimension_numbers<[1], [0], [0], [1], [0, 0, 1, 1], [], []>} : vector<8x32xf32>, vector<32x96xf32>, vector<8x96xf32> -> vector<8x96xf32>
    %119 = vector.extract_strided_slice %117 {offsets = [0, 0], sizes = [8, 64], strides = [1, 1]} : vector<8x96xf32> to vector<8x64xf32>
    %120 = vector.extract_strided_slice %118 {offsets = [0, 0], sizes = [8, 64], strides = [1, 1]} : vector<8x96xf32> to vector<8x64xf32>
    %121 = arith.addf %119, %120 : vector<8x64xf32>
    %122 = arith.negf %121 : vector<8x64xf32>
    %123 = math.exp %122 : vector<8x64xf32>
    %cst_53 = arith.constant 1.000000e+00 : f32
    %124 = vector.broadcast %cst_53 : f32 to vector<8x64xf32>
    %125 = arith.addf %124, %123 : vector<8x64xf32>
    %126 = arith.divf %124, %125 : vector<8x64xf32>
    %127 = vector.extract_strided_slice %126 {offsets = [0, 0], sizes = [8, 32], strides = [1, 1]} : vector<8x64xf32> to vector<8x32xf32>
    %128 = vector.extract_strided_slice %126 {offsets = [0, 32], sizes = [8, 32], strides = [1, 1]} : vector<8x64xf32> to vector<8x32xf32>
    %129 = vector.extract_strided_slice %117 {offsets = [0, 64], sizes = [8, 32], strides = [1, 1]} : vector<8x96xf32> to vector<8x32xf32>
    %130 = vector.extract_strided_slice %118 {offsets = [0, 64], sizes = [8, 32], strides = [1, 1]} : vector<8x96xf32> to vector<8x32xf32>
    %131 = arith.addf %130, %6 : vector<8x32xf32>
    %132 = arith.mulf %127, %131 : vector<8x32xf32>
    %133 = arith.addf %129, %132 : vector<8x32xf32>
    %134 = math.tanh %133 : vector<8x32xf32>
    %135 = arith.subf %115, %134 : vector<8x32xf32>
    %136 = arith.mulf %128, %135 : vector<8x32xf32>
    %137 = arith.addf %134, %136 : vector<8x32xf32>
    %c0_54 = arith.constant 0 : index
    %c0_55 = arith.constant 0 : index
    %138 = vector.load %arg7[%c0_54, %c0_55] : memref<8x32xf32, #tpu.memory_space<vmem>>, vector<8x32xf32>
    tpu.vector_store %arg7[%c0_54, %c0_55], %137 {strides = array<i32>} : memref<8x32xf32, #tpu.memory_space<vmem>>, vector<8x32xf32>,
    %c4_56 = arith.constant 4 : index
    %c0_57 = arith.constant 0 : index
    %c0_58 = arith.constant 0 : index
    %139 = vector.load %arg5[%c4_56, %c0_57, %c0_58] : memref<8x8x32xf32, #tpu.memory_space<vmem>>, vector<1x8x32xf32>
    %140 = vector.shape_cast %139 : vector<1x8x32xf32> to vector<8x32xf32>
    %141 = vector.shape_cast %137 : vector<8x32xf32> to vector<1x8x32xf32>
    tpu.vector_store %arg5[%c4_56, %c0_57, %c0_58], %141 {strides = array<i32>} : memref<8x8x32xf32, #tpu.memory_space<vmem>>, vector<1x8x32xf32>,
    %c0_59 = arith.constant 0 : index
    %c0_60 = arith.constant 0 : index
    %142 = vector.load %arg7[%c0_59, %c0_60] : memref<8x32xf32, #tpu.memory_space<vmem>>, vector<8x32xf32>
    %c5 = arith.constant 5 : index
    %c0_61 = arith.constant 0 : index
    %c0_62 = arith.constant 0 : index
    %143 = vector.load %arg1[%c5, %c0_61, %c0_62] : memref<8x8x96xf32, #tpu.memory_space<vmem>>, vector<1x8x96xf32>
    %144 = vector.shape_cast %143 : vector<1x8x96xf32> to vector<8x96xf32>
    %cst_63 = arith.constant dense<0.000000e+00> : vector<8x96xf32>
    %145 = tpu.matmul %142, %3, %cst_63 {dimension_numbers = #tpu.dot_dimension_numbers<[1], [0], [0], [1], [0, 0, 1, 1], [], []>} : vector<8x32xf32>, vector<32x96xf32>, vector<8x96xf32> -> vector<8x96xf32>
    %146 = vector.extract_strided_slice %144 {offsets = [0, 0], sizes = [8, 64], strides = [1, 1]} : vector<8x96xf32> to vector<8x64xf32>
    %147 = vector.extract_strided_slice %145 {offsets = [0, 0], sizes = [8, 64], strides = [1, 1]} : vector<8x96xf32> to vector<8x64xf32>
    %148 = arith.addf %146, %147 : vector<8x64xf32>
    %149 = arith.negf %148 : vector<8x64xf32>
    %150 = math.exp %149 : vector<8x64xf32>
    %cst_64 = arith.constant 1.000000e+00 : f32
    %151 = vector.broadcast %cst_64 : f32 to vector<8x64xf32>
    %152 = arith.addf %151, %150 : vector<8x64xf32>
    %153 = arith.divf %151, %152 : vector<8x64xf32>
    %154 = vector.extract_strided_slice %153 {offsets = [0, 0], sizes = [8, 32], strides = [1, 1]} : vector<8x64xf32> to vector<8x32xf32>
    %155 = vector.extract_strided_slice %153 {offsets = [0, 32], sizes = [8, 32], strides = [1, 1]} : vector<8x64xf32> to vector<8x32xf32>
    %156 = vector.extract_strided_slice %144 {offsets = [0, 64], sizes = [8, 32], strides = [1, 1]} : vector<8x96xf32> to vector<8x32xf32>
    %157 = vector.extract_strided_slice %145 {offsets = [0, 64], sizes = [8, 32], strides = [1, 1]} : vector<8x96xf32> to vector<8x32xf32>
    %158 = arith.addf %157, %6 : vector<8x32xf32>
    %159 = arith.mulf %154, %158 : vector<8x32xf32>
    %160 = arith.addf %156, %159 : vector<8x32xf32>
    %161 = math.tanh %160 : vector<8x32xf32>
    %162 = arith.subf %142, %161 : vector<8x32xf32>
    %163 = arith.mulf %155, %162 : vector<8x32xf32>
    %164 = arith.addf %161, %163 : vector<8x32xf32>
    %c0_65 = arith.constant 0 : index
    %c0_66 = arith.constant 0 : index
    %165 = vector.load %arg7[%c0_65, %c0_66] : memref<8x32xf32, #tpu.memory_space<vmem>>, vector<8x32xf32>
    tpu.vector_store %arg7[%c0_65, %c0_66], %164 {strides = array<i32>} : memref<8x32xf32, #tpu.memory_space<vmem>>, vector<8x32xf32>,
    %c5_67 = arith.constant 5 : index
    %c0_68 = arith.constant 0 : index
    %c0_69 = arith.constant 0 : index
    %166 = vector.load %arg5[%c5_67, %c0_68, %c0_69] : memref<8x8x32xf32, #tpu.memory_space<vmem>>, vector<1x8x32xf32>
    %167 = vector.shape_cast %166 : vector<1x8x32xf32> to vector<8x32xf32>
    %168 = vector.shape_cast %164 : vector<8x32xf32> to vector<1x8x32xf32>
    tpu.vector_store %arg5[%c5_67, %c0_68, %c0_69], %168 {strides = array<i32>} : memref<8x8x32xf32, #tpu.memory_space<vmem>>, vector<1x8x32xf32>,
    %c0_70 = arith.constant 0 : index
    %c0_71 = arith.constant 0 : index
    %169 = vector.load %arg7[%c0_70, %c0_71] : memref<8x32xf32, #tpu.memory_space<vmem>>, vector<8x32xf32>
    %c6 = arith.constant 6 : index
    %c0_72 = arith.constant 0 : index
    %c0_73 = arith.constant 0 : index
    %170 = vector.load %arg1[%c6, %c0_72, %c0_73] : memref<8x8x96xf32, #tpu.memory_space<vmem>>, vector<1x8x96xf32>
    %171 = vector.shape_cast %170 : vector<1x8x96xf32> to vector<8x96xf32>
    %cst_74 = arith.constant dense<0.000000e+00> : vector<8x96xf32>
    %172 = tpu.matmul %169, %3, %cst_74 {dimension_numbers = #tpu.dot_dimension_numbers<[1], [0], [0], [1], [0, 0, 1, 1], [], []>} : vector<8x32xf32>, vector<32x96xf32>, vector<8x96xf32> -> vector<8x96xf32>
    %173 = vector.extract_strided_slice %171 {offsets = [0, 0], sizes = [8, 64], strides = [1, 1]} : vector<8x96xf32> to vector<8x64xf32>
    %174 = vector.extract_strided_slice %172 {offsets = [0, 0], sizes = [8, 64], strides = [1, 1]} : vector<8x96xf32> to vector<8x64xf32>
    %175 = arith.addf %173, %174 : vector<8x64xf32>
    %176 = arith.negf %175 : vector<8x64xf32>
    %177 = math.exp %176 : vector<8x64xf32>
    %cst_75 = arith.constant 1.000000e+00 : f32
    %178 = vector.broadcast %cst_75 : f32 to vector<8x64xf32>
    %179 = arith.addf %178, %177 : vector<8x64xf32>
    %180 = arith.divf %178, %179 : vector<8x64xf32>
    %181 = vector.extract_strided_slice %180 {offsets = [0, 0], sizes = [8, 32], strides = [1, 1]} : vector<8x64xf32> to vector<8x32xf32>
    %182 = vector.extract_strided_slice %180 {offsets = [0, 32], sizes = [8, 32], strides = [1, 1]} : vector<8x64xf32> to vector<8x32xf32>
    %183 = vector.extract_strided_slice %171 {offsets = [0, 64], sizes = [8, 32], strides = [1, 1]} : vector<8x96xf32> to vector<8x32xf32>
    %184 = vector.extract_strided_slice %172 {offsets = [0, 64], sizes = [8, 32], strides = [1, 1]} : vector<8x96xf32> to vector<8x32xf32>
    %185 = arith.addf %184, %6 : vector<8x32xf32>
    %186 = arith.mulf %181, %185 : vector<8x32xf32>
    %187 = arith.addf %183, %186 : vector<8x32xf32>
    %188 = math.tanh %187 : vector<8x32xf32>
    %189 = arith.subf %169, %188 : vector<8x32xf32>
    %190 = arith.mulf %182, %189 : vector<8x32xf32>
    %191 = arith.addf %188, %190 : vector<8x32xf32>
    %c0_76 = arith.constant 0 : index
    %c0_77 = arith.constant 0 : index
    %192 = vector.load %arg7[%c0_76, %c0_77] : memref<8x32xf32, #tpu.memory_space<vmem>>, vector<8x32xf32>
    tpu.vector_store %arg7[%c0_76, %c0_77], %191 {strides = array<i32>} : memref<8x32xf32, #tpu.memory_space<vmem>>, vector<8x32xf32>,
    %c6_78 = arith.constant 6 : index
    %c0_79 = arith.constant 0 : index
    %c0_80 = arith.constant 0 : index
    %193 = vector.load %arg5[%c6_78, %c0_79, %c0_80] : memref<8x8x32xf32, #tpu.memory_space<vmem>>, vector<1x8x32xf32>
    %194 = vector.shape_cast %193 : vector<1x8x32xf32> to vector<8x32xf32>
    %195 = vector.shape_cast %191 : vector<8x32xf32> to vector<1x8x32xf32>
    tpu.vector_store %arg5[%c6_78, %c0_79, %c0_80], %195 {strides = array<i32>} : memref<8x8x32xf32, #tpu.memory_space<vmem>>, vector<1x8x32xf32>,
    %c0_81 = arith.constant 0 : index
    %c0_82 = arith.constant 0 : index
    %196 = vector.load %arg7[%c0_81, %c0_82] : memref<8x32xf32, #tpu.memory_space<vmem>>, vector<8x32xf32>
    %c7 = arith.constant 7 : index
    %c0_83 = arith.constant 0 : index
    %c0_84 = arith.constant 0 : index
    %197 = vector.load %arg1[%c7, %c0_83, %c0_84] : memref<8x8x96xf32, #tpu.memory_space<vmem>>, vector<1x8x96xf32>
    %198 = vector.shape_cast %197 : vector<1x8x96xf32> to vector<8x96xf32>
    %cst_85 = arith.constant dense<0.000000e+00> : vector<8x96xf32>
    %199 = tpu.matmul %196, %3, %cst_85 {dimension_numbers = #tpu.dot_dimension_numbers<[1], [0], [0], [1], [0, 0, 1, 1], [], []>} : vector<8x32xf32>, vector<32x96xf32>, vector<8x96xf32> -> vector<8x96xf32>
    %200 = vector.extract_strided_slice %198 {offsets = [0, 0], sizes = [8, 64], strides = [1, 1]} : vector<8x96xf32> to vector<8x64xf32>
    %201 = vector.extract_strided_slice %199 {offsets = [0, 0], sizes = [8, 64], strides = [1, 1]} : vector<8x96xf32> to vector<8x64xf32>
    %202 = arith.addf %200, %201 : vector<8x64xf32>
    %203 = arith.negf %202 : vector<8x64xf32>
    %204 = math.exp %203 : vector<8x64xf32>
    %cst_86 = arith.constant 1.000000e+00 : f32
    %205 = vector.broadcast %cst_86 : f32 to vector<8x64xf32>
    %206 = arith.addf %205, %204 : vector<8x64xf32>
    %207 = arith.divf %205, %206 : vector<8x64xf32>
    %208 = vector.extract_strided_slice %207 {offsets = [0, 0], sizes = [8, 32], strides = [1, 1]} : vector<8x64xf32> to vector<8x32xf32>
    %209 = vector.extract_strided_slice %207 {offsets = [0, 32], sizes = [8, 32], strides = [1, 1]} : vector<8x64xf32> to vector<8x32xf32>
    %210 = vector.extract_strided_slice %198 {offsets = [0, 64], sizes = [8, 32], strides = [1, 1]} : vector<8x96xf32> to vector<8x32xf32>
    %211 = vector.extract_strided_slice %199 {offsets = [0, 64], sizes = [8, 32], strides = [1, 1]} : vector<8x96xf32> to vector<8x32xf32>
    %212 = arith.addf %211, %6 : vector<8x32xf32>
    %213 = arith.mulf %208, %212 : vector<8x32xf32>
    %214 = arith.addf %210, %213 : vector<8x32xf32>
    %215 = math.tanh %214 : vector<8x32xf32>
    %216 = arith.subf %196, %215 : vector<8x32xf32>
    %217 = arith.mulf %209, %216 : vector<8x32xf32>
    %218 = arith.addf %215, %217 : vector<8x32xf32>
    %c0_87 = arith.constant 0 : index
    %c0_88 = arith.constant 0 : index
    %219 = vector.load %arg7[%c0_87, %c0_88] : memref<8x32xf32, #tpu.memory_space<vmem>>, vector<8x32xf32>
    tpu.vector_store %arg7[%c0_87, %c0_88], %218 {strides = array<i32>} : memref<8x32xf32, #tpu.memory_space<vmem>>, vector<8x32xf32>,
    %c7_89 = arith.constant 7 : index
    %c0_90 = arith.constant 0 : index
    %c0_91 = arith.constant 0 : index
    %220 = vector.load %arg5[%c7_89, %c0_90, %c0_91] : memref<8x8x32xf32, #tpu.memory_space<vmem>>, vector<1x8x32xf32>
    %221 = vector.shape_cast %220 : vector<1x8x32xf32> to vector<8x32xf32>
    %222 = vector.shape_cast %218 : vector<8x32xf32> to vector<1x8x32xf32>
    tpu.vector_store %arg5[%c7_89, %c0_90, %c0_91], %222 {strides = array<i32>} : memref<8x8x32xf32, #tpu.memory_space<vmem>>, vector<1x8x32xf32>,
    %c0_i32_92 = arith.constant 0 : i32
    %223 = arith.cmpi eq, %arg0, %c0_i32_92 : i32
    %224 = arith.extui %223 : i1 to i32
    %c0_i32_93 = arith.constant 0 : i32
    %225 = arith.cmpi ne, %224, %c0_i32_93 : i32
    scf.if %225 {
      %c0_94 = arith.constant 0 : index
      %c0_95 = arith.constant 0 : index
      %226 = vector.load %arg7[%c0_94, %c0_95] : memref<8x32xf32, #tpu.memory_space<vmem>>, vector<8x32xf32>
      %c0_96 = arith.constant 0 : index
      %c0_97 = arith.constant 0 : index
      %227 = vector.load %arg6[%c0_96, %c0_97] : memref<8x32xf32, #tpu.memory_space<vmem>>, vector<8x32xf32>
      tpu.vector_store %arg6[%c0_96, %c0_97], %226 {strides = array<i32>} : memref<8x32xf32, #tpu.memory_space<vmem>>, vector<8x32xf32>,
    } else {
    }
    return
  }
  func.func @transform_0(%arg0: i32) -> (i32, i32, i32) {
    %c0_i32 = arith.constant 0 : i32
    %c0_i32_0 = arith.constant 0 : i32
    %c0_i32_1 = arith.constant 0 : i32
    return %arg0, %c0_i32, %c0_i32_0 : i32, i32, i32
  }
  func.func @transform_1(%arg0: i32) -> (i32, i32) {
    %c0_i32 = arith.constant 0 : i32
    %c0_i32_0 = arith.constant 0 : i32
    %c0_i32_1 = arith.constant 0 : i32
    return %c0_i32, %c0_i32_0 : i32, i32
  }
  func.func @transform_2(%arg0: i32) -> (i32, i32) {
    %c0_i32 = arith.constant 0 : i32
    %c0_i32_0 = arith.constant 0 : i32
    %c0_i32_1 = arith.constant 0 : i32
    return %c0_i32, %c0_i32_0 : i32, i32
  }
  func.func @transform_3(%arg0: i32) -> (i32, i32) {
    %c0_i32 = arith.constant 0 : i32
    %c0_i32_0 = arith.constant 0 : i32
    %c0_i32_1 = arith.constant 0 : i32
    return %c0_i32, %c0_i32_0 : i32, i32
  }
  func.func @transform_4(%arg0: i32) -> (i32, i32, i32) {
    %c0_i32 = arith.constant 0 : i32
    %c0_i32_0 = arith.constant 0 : i32
    %c0_i32_1 = arith.constant 0 : i32
    return %arg0, %c0_i32, %c0_i32_0 : i32, i32, i32
  }
  func.func @transform_5(%arg0: i32) -> (i32, i32) {
    %c0_i32 = arith.constant 0 : i32
    %c0_i32_0 = arith.constant 0 : i32
    %c0_i32_1 = arith.constant 0 : i32
    return %c0_i32, %c0_i32_0 : i32, i32
  }
}

module attributes {stable_mosaic.version = 11 : i64} {
  func.func @_gemm_bias_kernel(%arg0: i32, %arg1: memref<64x32xf32, #tpu.memory_space<vmem>>, %arg2: memref<32x128xf32, #tpu.memory_space<vmem>>, %arg3: memref<1x128xf32, #tpu.memory_space<vmem>>, %arg4: memref<64x128xf32, #tpu.memory_space<vmem>>) attributes {dimension_semantics = [#tpu.dimension_semantics<parallel>], iteration_bounds = array<i64: 1>, scalar_prefetch = 0 : i64, scratch_operands = 0 : i64, tpu.core_type = #tpu.core_type<tc>, window_params = [{transform_indices = @transform_0, window_bounds = array<i64: 64, 32>}, {pipeline_mode = #tpu.pipeline_mode<synchronous>, transform_indices = @transform_1, window_bounds = array<i64: 32, 128>}, {pipeline_mode = #tpu.pipeline_mode<synchronous>, transform_indices = @transform_2, window_bounds = array<i64: 1, 128>}, {transform_indices = @transform_3, window_bounds = array<i64: 64, 128>}]} {
    %c0 = arith.constant 0 : index
    %c0_0 = arith.constant 0 : index
    %0 = vector.load %arg1[%c0, %c0_0] : memref<64x32xf32, #tpu.memory_space<vmem>>, vector<64x32xf32>
    %cst = arith.constant 0.000000e+00 : f32
    %1 = vector.broadcast %cst : f32 to vector<64x32xf32>
    %2 = arith.maximumf %0, %1 : vector<64x32xf32>
    %c0_1 = arith.constant 0 : index
    %c0_2 = arith.constant 0 : index
    %3 = vector.load %arg2[%c0_1, %c0_2] : memref<32x128xf32, #tpu.memory_space<vmem>>, vector<32x128xf32>
    %cst_3 = arith.constant dense<0.000000e+00> : vector<64x128xf32>
    %4 = tpu.matmul %2, %3, %cst_3 {dimension_numbers = #tpu.dot_dimension_numbers<[1], [0], [0], [1], [0, 0, 1, 1], [], []>} : vector<64x32xf32>, vector<32x128xf32>, vector<64x128xf32> -> vector<64x128xf32>
    %c0_4 = arith.constant 0 : index
    %c0_5 = arith.constant 0 : index
    %5 = vector.load %arg3[%c0_4, %c0_5] : memref<1x128xf32, #tpu.memory_space<vmem>>, vector<1x128xf32>
    %6 = vector.broadcast %5 : vector<1x128xf32> to vector<64x128xf32>
    %7 = arith.addf %4, %6 : vector<64x128xf32>
    %c0_6 = arith.constant 0 : index
    %c0_7 = arith.constant 0 : index
    %8 = vector.load %arg4[%c0_6, %c0_7] : memref<64x128xf32, #tpu.memory_space<vmem>>, vector<64x128xf32>
    tpu.vector_store %arg4[%c0_6, %c0_7], %7 {strides = array<i32>} : memref<64x128xf32, #tpu.memory_space<vmem>>, vector<64x128xf32>,
    return
  }
  func.func @transform_0(%arg0: i32) -> (i32, i32) {
    %c0_i32 = arith.constant 0 : i32
    %c0_i32_0 = arith.constant 0 : i32
    return %arg0, %c0_i32 : i32, i32
  }
  func.func @transform_1(%arg0: i32) -> (i32, i32) {
    %c0_i32 = arith.constant 0 : i32
    %c0_i32_0 = arith.constant 0 : i32
    %c0_i32_1 = arith.constant 0 : i32
    return %c0_i32, %c0_i32_0 : i32, i32
  }
  func.func @transform_2(%arg0: i32) -> (i32, i32) {
    %c0_i32 = arith.constant 0 : i32
    %c0_i32_0 = arith.constant 0 : i32
    %c0_i32_1 = arith.constant 0 : i32
    return %c0_i32, %c0_i32_0 : i32, i32
  }
  func.func @transform_3(%arg0: i32) -> (i32, i32) {
    %c0_i32 = arith.constant 0 : i32
    %c0_i32_0 = arith.constant 0 : i32
    return %arg0, %c0_i32 : i32, i32
  }
}

</mosaic_0001>

<bundles_post_ra>
// kernel: grunet_forward.7
= control target key start
LH: loop header
LB: loop body
LE: loop exit
PB: predicated region body
PF: predicated region fallthrough
CT: control target
= control target key end

     0   :  { %vm33_vm0 = vcmask 261120   ;;  %vm163_vm1 = vcmask 785408   ;;  %s328_s1 = inlined_call_operand.vmem [shape: f32[32,96], index: 1, kind: input, shape index: {}]   ;;  %s329_s0 = inlined_call_operand.vmem [shape: f32[64,32], index: 0, kind: input, shape index: {}]   ;;  %s330_s2 = inlined_call_operand.vmem [shape: f32[1,96], index: 2, kind: input, shape index: {}]   ;;  %s331_s3 = inlined_call_operand.vmem [shape: f32[64,96], index: 3, kind: output, shape index: {}]  }
   0x1   :  { %v22_v0 = vld [vmem:[%s328_s1] sm:$0xff]  ;;  %v23_v1 = vld [vmem:[%s328_s1 + $0x8] sm:$0xff]  ;;  %v24_v2 = vld [vmem:[%s328_s1 + $0x10] sm:$0xff] }
   0x2   :  { %v217_v3 = vpack.c.bf16 %v23_v1, %v22_v0  ;;  %v25_v4 = vld [vmem:[%s328_s1 + $0x18] sm:$0xff]  ;;  %v14_v5 = vld [vmem:[%s329_s0] sm:$0xff]  ;;  %v15_v8 = vld [vmem:[%s329_s0 + $0x8] sm:$0xff] }
   0x3   :  { %v18_v6 = vld [vmem:[%s329_s0 + $0x20] sm:$0xff]  ;;  %v221_v7 = vpack.c.bf16 %v25_v4, %v24_v2  ;;  %205 = vmatprep.mubr.msk.f32.mxu0 %vm33_vm0, %v14_v5  ;;  %v19_v9 = vld [vmem:[%s329_s0 + $0x28] sm:$0xff]  ;;  %v16_v10 = vld [vmem:[%s329_s0 + $0x10] sm:$0xff] }
   0x4   :  { %211 = vmatprep.mubr.msk.f32.mxu1 %vm33_vm0, %v18_v6  ;;  %218 = vmatprep.subr.bf16.mxu0 %v217_v3  ;;  %v20_v11 = vld [vmem:[%s329_s0 + $0x30] sm:$0xff]  ;;  %v17_v12 = vld [vmem:[%s329_s0 + $0x18] sm:$0xff]  ;;  %v176_v14 = vld [vmem:[%s330_s2] ss:$0 sm:$0xff] }
   0x5   :  { %225 = vmatprep.subr.bf16.mxu1 %v217_v3  ;;  %220 = vmatpush3.bf16.msra.mxu0 %v217_v3  ;;  %v21_v13 = vld [vmem:[%s329_s0 + $0x38] sm:$0xff] }
   0x6   :  { %227 = vmatpush3.bf16.msra.mxu1 %v217_v3  ;;  %222 = vmatprep.subr.bf16.mxu0 %v221_v7 }
   0x7   :  { %226 = vmatprep.subr.bf16.mxu1 %v221_v7 }
   0x9   :  { %224 = vmatpush3.bf16.msra.mxu0 %v221_v7 }
   0xa   :  { %228 = vmatpush3.bf16.msra.mxu1 %v221_v7 }
   0xc   :  { %206 = vmatmul.mubr.msk.f32.vlgmr.msra.gmra.mrb[0].mxu0 %vm33_vm0, %v15_v8 }
   0xd   :  { %212 = vmatmul.mubr.msk.f32.vlgmr.msra.gmra.mrb[0].mxu1 %vm33_vm0, %v19_v9  ;;  %208 = vmatprep.mubr.msk.f32.mxu0 %vm33_vm0, %v16_v10 }
   0xe   :  { %214 = vmatprep.mubr.msk.f32.mxu1 %vm33_vm0, %v20_v11 }
  0x10   :  { %209 = vmatmul.mubr.msk.f32.gmra.mrb[2].mxu0 %vm33_vm0, %v17_v12 }
  0x11   :  { %215 = vmatmul.mubr.msk.f32.gmra.mrb[2].mxu1 %vm33_vm0, %v21_v13 }
  0xdf   :  { %v207_v15 = vpop.f32.mrb[0].mxu0 }
  0xe0   :  { %v213_v16 = vpop.f32.mrb[0].mxu1  ;;  %v130_v17 = vadd.f32 %v207_v15, %v176_v14  ;;  %v124_v19 = vpop.f32.mrb[1].mxu0 }
  0xe1   :  { %v150_v18 = vadd.f32 %v213_v16, %v176_v14  ;;  %v144_v20 = vpop.f32.mrb[1].mxu1  ;;  %v125_v21 = vadd.f32 %v176_v14, %v124_v19 }
  0xe2   :  { %v145_v22 = vadd.f32 %v176_v14, %v144_v20  ;;  %165 = vst.msk [vmem:[%s331_s3 + $0x8] sm:$0xff] %vm163_vm1, %v130_v17 }
  0xe3   :  { %169 = vst.msk [vmem:[%s331_s3 + $0x28] sm:$0xff] %vm163_vm1, %v150_v18  ;;  %164 = vst.msk [vmem:[%s331_s3] sm:$0xff] %vm163_vm1, %v125_v21  ;;  %v210_v23 = vpop.f32.mrb[2].mxu0 }
  0xe4   :  { %168 = vst.msk [vmem:[%s331_s3 + $0x20] sm:$0xff] %vm163_vm1, %v145_v22  ;;  %v216_v24 = vpop.f32.mrb[2].mxu1  ;;  %v140_v25 = vadd.f32 %v210_v23, %v176_v14  ;;  %v134_v27 = vpop.f32.mrb[3].mxu0 }
  0xe5   :  { %v160_v26 = vadd.f32 %v216_v24, %v176_v14  ;;  %v154_v28 = vpop.f32.mrb[3].mxu1  ;;  %v135_v29 = vadd.f32 %v176_v14, %v134_v27 }
  0xe6   :  { %v155_v30 = vadd.f32 %v176_v14, %v154_v28  ;;  %167 = vst.msk [vmem:[%s331_s3 + $0x18] sm:$0xff] %vm163_vm1, %v140_v25 }
  0xe7   :  { %171 = vst.msk [vmem:[%s331_s3 + $0x38] sm:$0xff] %vm163_vm1, %v160_v26  ;;  %166 = vst.msk [vmem:[%s331_s3 + $0x10] sm:$0xff] %vm163_vm1, %v135_v29 }
  0xe8   :  { %170 = vst.msk [vmem:[%s331_s3 + $0x30] sm:$0xff] %vm163_vm1, %v155_v30 }

// kernel: grunet_forward.5
= control target key start
LH: loop header
LB: loop body
LE: loop exit
PB: predicated region body
PF: predicated region fallthrough
CT: control target
= control target key end

     0   :  { %vm55_vm0 = vcmask 1043456   ;;  %vm30_vm1 = vcmask 31744   ;;  %vm164_vm2 = vcmask 785408   ;;  %s302_s1 = inlined_call_operand.vmem [shape: f32[4,96], index: 1, kind: input, shape index: {}]   ;;  %s303_s0 = inlined_call_operand.vmem [shape: f32[64,4], index: 0, kind: input, shape index: {}]   ;;  %s304_s2 = inlined_call_operand.vmem [shape: f32[1,96], index: 2, kind: input, shape index: {}]   ;;  %s305_s3 = inlined_call_operand.vmem [shape: f32[64,96], index: 3, kind: output, shape index: {}]  }
   0x1   :  { %v22_v0 = vld [vmem:[%s302_s1] sm:$0xf]  ;;  %v15_v3 = vld [vmem:[%s303_s0 + $0x8] sm:$0xff]  ;;  %v16_v5 = vld [vmem:[%s303_s0 + $0x10] sm:$0xff] }
   0x2   :  { %v14_v1 = vld [vmem:[%s303_s0] sm:$0xff]  ;;  %196 = vmatprep.subr.msk.mxu0 %vm55_vm0, %v22_v0  ;;  %210 = vmatprep.subr.msk.mxu1 %vm55_vm0, %v22_v0  ;;  %v19_v4 = vld [vmem:[%s303_s0 + $0x28] sm:$0xff]  ;;  %v20_v6 = vld [vmem:[%s303_s0 + $0x30] sm:$0xff] }
   0x3   :  { %v18_v2 = vld [vmem:[%s303_s0 + $0x20] sm:$0xff]  ;;  %197 = vmatpush3.msk.msra.mxu0 %vm55_vm0, %v22_v0  ;;  %211 = vmatpush3.msk.msra.mxu1 %vm55_vm0, %v22_v0  ;;  %v17_v7 = vld [vmem:[%s303_s0 + $0x18] sm:$0xff] }
   0x4   :  { %198 = vmatprep.mubr.msk.f32.mxu0 %vm30_vm1, %v14_v1  ;;  %204 = vmatprep.mubr.msk.f32.mxu1 %vm30_vm1, %v18_v2  ;;  %v21_v8 = vld [vmem:[%s303_s0 + $0x38] sm:$0xff]  ;;  %v177_v9 = vld [vmem:[%s304_s2] ss:$0 sm:$0xff] }
   0x5   :  { %199 = vmatmul.mubr.msk.f32.vlgmr.msra.gmra.mrb[0].mxu0 %vm30_vm1, %v15_v3  ;;  %205 = vmatmul.mubr.msk.f32.vlgmr.msra.gmra.mrb[0].mxu1 %vm30_vm1, %v19_v4 }
   0x6   :  { %201 = vmatprep.mubr.msk.f32.mxu0 %vm30_vm1, %v16_v5  ;;  %207 = vmatprep.mubr.msk.f32.mxu1 %vm30_vm1, %v20_v6 }
   0x9   :  { %202 = vmatmul.mubr.msk.f32.gmra.mrb[2].mxu0 %vm30_vm1, %v17_v7  ;;  %208 = vmatmul.mubr.msk.f32.gmra.mrb[2].mxu1 %vm30_vm1, %v21_v8 }
  0xd8   :  { %v200_v10 = vpop.f32.mrb[0].mxu0  ;;  %v206_v11 = vpop.f32.mrb[0].mxu1 }
  0xd9   :  { %v131_v12 = vadd.f32 %v200_v10, %v177_v9  ;;  %v151_v13 = vadd.f32 %v206_v11, %v177_v9  ;;  %v125_v14 = vpop.f32.mrb[1].mxu0  ;;  %v145_v15 = vpop.f32.mrb[1].mxu1 }
  0xda   :  { %v126_v16 = vadd.f32 %v177_v9, %v125_v14  ;;  %v146_v17 = vadd.f32 %v177_v9, %v145_v15 }
  0xdb   :  { %166 = vst.msk [vmem:[%s305_s3 + $0x8] sm:$0xff] %vm164_vm2, %v131_v12  ;;  %170 = vst.msk [vmem:[%s305_s3 + $0x28] sm:$0xff] %vm164_vm2, %v151_v13 }
  0xdc   :  { %165 = vst.msk [vmem:[%s305_s3] sm:$0xff] %vm164_vm2, %v126_v16  ;;  %169 = vst.msk [vmem:[%s305_s3 + $0x20] sm:$0xff] %vm164_vm2, %v146_v17  ;;  %v203_v18 = vpop.f32.mrb[2].mxu0  ;;  %v209_v19 = vpop.f32.mrb[2].mxu1 }
  0xdd   :  { %v141_v20 = vadd.f32 %v203_v18, %v177_v9  ;;  %v161_v21 = vadd.f32 %v209_v19, %v177_v9  ;;  %v135_v22 = vpop.f32.mrb[3].mxu0  ;;  %v155_v23 = vpop.f32.mrb[3].mxu1 }
  0xde   :  { %v136_v24 = vadd.f32 %v177_v9, %v135_v22  ;;  %v156_v25 = vadd.f32 %v177_v9, %v155_v23 }
  0xdf   :  { %168 = vst.msk [vmem:[%s305_s3 + $0x18] sm:$0xff] %vm164_vm2, %v141_v20  ;;  %172 = vst.msk [vmem:[%s305_s3 + $0x38] sm:$0xff] %vm164_vm2, %v161_v21 }
  0xe0   :  { %167 = vst.msk [vmem:[%s305_s3 + $0x10] sm:$0xff] %vm164_vm2, %v136_v24  ;;  %171 = vst.msk [vmem:[%s305_s3 + $0x30] sm:$0xff] %vm164_vm2, %v156_v25 }

// kernel: grunet_forward.9
= control target key start
LH: loop header
LB: loop body
LE: loop exit
PB: predicated region body
PF: predicated region fallthrough
CT: control target
= control target key end

     0   :  { %vm41_vm0 = vcmask 261120   ;;  %s327_s1 = inlined_call_operand.vmem [shape: f32[32,128], index: 1, kind: input, shape index: {}]   ;;  %s328_s0 = inlined_call_operand.vmem [shape: f32[64,32], index: 0, kind: input, shape index: {}]   ;;  %s329_s2 = inlined_call_operand.vmem [shape: f32[1,128], index: 2, kind: input, shape index: {}]   ;;  %s330_s3 = inlined_call_operand.vmem [shape: f32[64,128], index: 3, kind: output, shape index: {}]  }
   0x1   :  { %v30_v0 = vld [vmem:[%s327_s1] sm:$0xff]  ;;  %v31_v1 = vld [vmem:[%s327_s1 + $0x8] sm:$0xff]  ;;  %v32_v2 = vld [vmem:[%s327_s1 + $0x10] sm:$0xff] }
   0x2   :  { %v224_v3 = vpack.c.bf16 %v31_v1, %v30_v0  ;;  %v33_v4 = vld [vmem:[%s327_s1 + $0x18] sm:$0xff]  ;;  %v14_v5 = vld [vmem:[%s328_s0] sm:$0xff]  ;;  %v15_v10 = vld [vmem:[%s328_s0 + $0x8] sm:$0xff] }
   0x3   :  { %v18_v6 = vld [vmem:[%s328_s0 + $0x20] sm:$0xff]  ;;  %v228_v7 = vpack.c.bf16 %v33_v4, %v32_v2  ;;  %v22_v8 = vmax.f32 %v14_v5, 0.0  ;;  %v19_v11 = vld [vmem:[%s328_s0 + $0x28] sm:$0xff]  ;;  %v16_v12 = vld [vmem:[%s328_s0 + $0x10] sm:$0xff]  ;;  %v23_v14 = vmax.f32 %v15_v10, 0.0 }
   0x4   :  { %v26_v9 = vmax.f32 %v18_v6, 0.0  ;;  %225 = vmatprep.subr.bf16.mxu0 %v224_v3  ;;  %232 = vmatprep.subr.bf16.mxu1 %v224_v3  ;;  %v20_v13 = vld [vmem:[%s328_s0 + $0x30] sm:$0xff]  ;;  %v27_v15 = vmax.f32 %v19_v11, 0.0  ;;  %v24_v16 = vmax.f32 %v16_v12, 0.0  ;;  %v17_v18 = vld [vmem:[%s328_s0 + $0x18] sm:$0xff] }
   0x5   :  { %227 = vmatpush3.bf16.msra.mxu0 %v224_v3  ;;  %234 = vmatpush3.bf16.msra.mxu1 %v224_v3  ;;  %v28_v17 = vmax.f32 %v20_v13, 0.0  ;;  %v21_v19 = vld [vmem:[%s328_s0 + $0x38] sm:$0xff]  ;;  %v25_v20 = vmax.f32 %v17_v18, 0.0  ;;  %v183_v22 = vld [vmem:[%s329_s2] ss:$0 sm:$0xff] }
   0x6   :  { %229 = vmatprep.subr.bf16.mxu0 %v228_v7  ;;  %233 = vmatprep.subr.bf16.mxu1 %v228_v7  ;;  %v29_v21 = vmax.f32 %v21_v19, 0.0 }
   0x7   :  { %212 = vmatprep.mubr.msk.f32.mxu0 %vm41_vm0, %v22_v8  ;;  %218 = vmatprep.mubr.msk.f32.mxu1 %vm41_vm0, %v26_v9 }
   0x9   :  { %231 = vmatpush3.bf16.msra.mxu0 %v228_v7  ;;  %235 = vmatpush3.bf16.msra.mxu1 %v228_v7 }
   0xc   :  { %213 = vmatmul.mubr.msk.f32.vlgmr.msra.gmra.mrb[0].mxu0 %vm41_vm0, %v23_v14  ;;  %219 = vmatmul.mubr.msk.f32.vlgmr.msra.gmra.mrb[0].mxu1 %vm41_vm0, %v27_v15 }
   0xd   :  { %215 = vmatprep.mubr.msk.f32.mxu0 %vm41_vm0, %v24_v16  ;;  %221 = vmatprep.mubr.msk.f32.mxu1 %vm41_vm0, %v28_v17 }
  0x10   :  { %216 = vmatmul.mubr.msk.f32.gmra.mrb[2].mxu0 %vm41_vm0, %v25_v20  ;;  %222 = vmatmul.mubr.msk.f32.gmra.mrb[2].mxu1 %vm41_vm0, %v29_v21 }
  0xdf   :  { %v214_v23 = vpop.f32.mrb[0].mxu0  ;;  %v220_v24 = vpop.f32.mrb[0].mxu1 }
  0xe0   :  { %v138_v25 = vadd.f32 %v214_v23, %v183_v22  ;;  %v158_v26 = vadd.f32 %v220_v24, %v183_v22  ;;  %v132_v27 = vpop.f32.mrb[1].mxu0  ;;  %v152_v28 = vpop.f32.mrb[1].mxu1 }
  0xe1   :  { %v133_v29 = vadd.f32 %v183_v22, %v132_v27  ;;  %v153_v30 = vadd.f32 %v183_v22, %v152_v28 }
  0xe2   :  { %172 = vst [vmem:[%s330_s3 + $0x8] sm:$0xff] %v138_v25  ;;  %176 = vst [vmem:[%s330_s3 + $0x28] sm:$0xff] %v158_v26 }
  0xe3   :  { %171 = vst [vmem:[%s330_s3] sm:$0xff] %v133_v29  ;;  %175 = vst [vmem:[%s330_s3 + $0x20] sm:$0xff] %v153_v30  ;;  %v217_v31 = vpop.f32.mrb[2].mxu0  ;;  %v223_v32 = vpop.f32.mrb[2].mxu1 }
  0xe4   :  { %v148_v33 = vadd.f32 %v217_v31, %v183_v22  ;;  %v168_v34 = vadd.f32 %v223_v32, %v183_v22  ;;  %v142_v35 = vpop.f32.mrb[3].mxu0  ;;  %v162_v36 = vpop.f32.mrb[3].mxu1 }
  0xe5   :  { %v143_v37 = vadd.f32 %v183_v22, %v142_v35  ;;  %v163_v38 = vadd.f32 %v183_v22, %v162_v36 }
  0xe6   :  { %174 = vst [vmem:[%s330_s3 + $0x18] sm:$0xff] %v148_v33  ;;  %178 = vst [vmem:[%s330_s3 + $0x38] sm:$0xff] %v168_v34 }
  0xe7   :  { %173 = vst [vmem:[%s330_s3 + $0x10] sm:$0xff] %v143_v37  ;;  %177 = vst [vmem:[%s330_s3 + $0x30] sm:$0xff] %v163_v38 }

// kernel: grunet_forward.6
= control target key start
LH: loop header
LB: loop body
LE: loop exit
PB: predicated region body
PF: predicated region fallthrough
CT: control target
= control target key end

     0   :  { %vm24_vm0 = vcmask 261120   ;;  %v1247_v0 = vmov 0.0|0.0   ;;  %vm1248_vm1 = vmmov 0   ;;  %v1249_v4 = vmov 0.0   ;;  %s1250_s30 = smov 64   ;;  %s1488_s2 = inlined_call_operand.vmem [shape: f32[32,96], index: 2, kind: input, shape index: {}]   ;;  %s1489_s1 = inlined_call_operand.vmem [shape: f32[8,32], index: 1, kind: input, shape index: {}]   ;;  %s1490_s3 = inlined_call_operand.vmem [shape: f32[1,32], index: 3, kind: input, shape index: {}]   ;;  %s1491_s0 = inlined_call_operand.vmem [shape: f32[8,8,96], index: 0, kind: input, shape index: {}]   ;;  %s1492_s4 = inlined_call_operand.vmem [shape: f32[8,8,32], index: 4, kind: output, shape index: {0}]   ;;  %s1493_s5 = inlined_call_operand.vmem [shape: f32[8,32], index: 5, kind: output, shape index: {1}]  }
   0x1   :  { %1146 = vmatprep.subr.bf16.mxu0 %v1247_v0  ;;  %v26_v1 = vld [vmem:[%s1488_s2] sm:$0xff]  ;;  %v27_v2 = vld [vmem:[%s1488_s2 + $0x8] sm:$0xff]  ;;  %v28_v3 = vld [vmem:[%s1488_s2 + $0x10] sm:$0xff]  ;;  %1066 = vmatprep.mubr.msk.f32.mxu0 %vm1248_vm1, %v1249_v4 }
   0x2   :  { %v1294_v5 = vpack.c.bf16 %v27_v2, %v26_v1  ;;  %v29_v6 = vld [vmem:[%s1488_s2 + $0x18] sm:$0xff]  ;;  %v23_v7 = vld [vmem:[%s1489_s1] sm:$0xff]  ;;  %1152 = vmatprep.subr.bf16.mxu1 %v1247_v0  ;;  %1077 = vmatprep.mubr.msk.f32.mxu1 %vm1248_vm1, %v1249_v4  ;;  %v990_v37 = vld [vmem:[%s1491_s0 + $0x8] sm:$0xff] }
   0x3   :  { %v987_v8 = vld [vmem:[%s1490_s3] ss:$0 sm:$0xff]  ;;  %25 = vst.msk [vmem:[#allocation2] sm:$0xff] %vm24_vm0, %v23_v7  ;;  %v1311_v9 = vpack.c.bf16 %v29_v6, %v28_v3  ;;  %s1251_s3 = smov 32   ;;  %v994_v59 = vld [vmem:[%s1491_s0 + $0x10] sm:$0xff] }
   0x4   :  { %119 = vrot.lane.b32.xlu0 %v987_v8, %s1250_s30  ;;  %1148 = vmatpush3.bf16.msra.mxu0 %v1294_v5  ;;  %v37_v15 = vld [vmem:[%s1491_s0] sm:$0xff] }
   0x5   :  { %1154 = vmatpush3.bf16.msra.mxu1 %v1294_v5  ;;  %1149 = vmatprep.subr.bf16.mxu0 %v1247_v0 }
   0x6   :  { %1155 = vmatprep.subr.bf16.mxu1 %v1247_v0 }
   0x8   :  { %1151 = vmatpush3.bf16.msra.mxu0 %v1311_v9 }
   0x9   :  { %1157 = vmatpush3.bf16.msra.mxu1 %v1311_v9  ;;  %1158 = vmatprep.subr.bf16.mxu0 %v1247_v0 }
   0xa   :  { %1164 = vmatprep.subr.bf16.mxu1 %v1247_v0  ;;  %v36_v10 = vld [vmem:[#allocation2] sm:$0xff] }
   0xb   :  { %1067 = vmatmul.mubr.msk.f32.vlgmr.msra.gmra.mrb[0].mxu0 %vm24_vm0, %v36_v10 }
   0xc   :  { %1160 = vmatpush3.bf16.msra.mxu0 %v1294_v5  ;;  %1088 = vmatprep.mubr.msk.f32.mxu0 %vm1248_vm1, %v1249_v4 }
   0xd   :  { %1161 = vmatprep.subr.bf16.mxu0 %v1247_v0 }
  0x10   :  { %1163 = vmatpush3.bf16.msra.mxu0 %v1311_v9 }
  0x11   :  { %1170 = vmatprep.subr.bf16.mxu0 %v1247_v0 }
  0x76   :  { %v1327_v11 = vpop.permute.xlu0 %119 }
  0xde   :  { %v108_v12 = vpop.f32.mrb[0].mxu0 }
  0xdf   :  { %v122_v13 = vadd.f32 %v1327_v11, %v108_v12  ;;  %v1068_v14 = vpop.f32.mrb[1].mxu0  ;;  %v112_v16 = vadd.f32 %v108_v12, %v37_v15 }
  0xe1   :  { %124 = vrot.lane.b32.xlu0 %v122_v13, %s1250_s30  ;;  %v989_v17 = vmul.f32 -1.442695, %v112_v16 }
  0xe3   :  { %1199 = vpow2.f32 %v989_v17 }
  0xed   :  { %v1200_v18 = vpop.eup %1199 }
  0xee   :  { %v116_v19 = vadd.f32 1.0, %v1200_v18 }
  0xf0   :  { %1201 = vrcp.f32 %v116_v19 }
  0xfa   :  { %v1202_v20 = vpop.eup %1201 }
 0x153   :  { %v125_v21 = vpop.permute.xlu0 %124 }
 0x154   :  { %v127_v22 = vmul.f32 %v1202_v20, %v125_v21 }
 0x156   :  { %129 = vrot.lane.b32.xlu1 %v127_v22, %s1250_s30  ;;  %v998_v22 = vld [vmem:[%s1491_s0 + $0x18] sm:$0xff] }
 0x1c8   :  { %v130_v23 = vpop.permute.xlu1 %129 }
 0x1c9   :  { %v132_v24 = vadd.f32 %v130_v23, %v37_v15 }
 0x1cb   :  { %1203 = vtanh.f32 %v132_v24 }
 0x1d5   :  { %v1204_v25 = vpop.eup %1203 }
 0x1d6   :  { %135 = vrot.lane.b32.xlu1 %v1204_v25, %s1250_s30 }
 0x248   :  { %v136_v26 = vpop.permute.xlu1 %135 }
 0x249   :  { %v138_v27 = vsub.f32 %v36_v10, %v136_v26 }
 0x24b   :  { %140 = vrot.lane.b32.xlu0 %v138_v27, %s1251_s3 }
 0x2bd   :  { %v141_v28 = vpop.permute.xlu0 %140 }
 0x2be   :  { %v143_v29 = vmul.f32 %v1202_v20, %v141_v28 }
 0x2c0   :  { %145 = vrot.lane.b32.xlu1 %v143_v29, %s1251_s3 }
 0x332   :  { %v146_v30 = vpop.permute.xlu1 %145 }
 0x333   :  { %v148_v31 = vadd.f32 %v1204_v25, %v146_v30 }
 0x335   :  { %150 = vrot.lane.b32.xlu0 %v148_v31, %s1250_s30 }
 0x3a7   :  { %v151_v32 = vpop.permute.xlu0 %150 }
 0x3a8   :  { %153 = vst.msk [vmem:[#allocation2] sm:$0xff] %vm24_vm0, %v151_v32  ;;  %154 = vst.msk [vmem:[%s1492_s4] sm:$0xff] %vm24_vm0, %v151_v32 }
 0x3af   :  { %v155_v33 = vld [vmem:[#allocation2] sm:$0xff] }
 0x3b0   :  { %1078 = vmatmul.mubr.msk.f32.vlgmr.msra.gmra.mrb[0].mxu1 %vm24_vm0, %v155_v33 }
 0x3b1   :  { %1166 = vmatpush3.bf16.msra.mxu1 %v1294_v5  ;;  %1099 = vmatprep.mubr.msk.f32.mxu1 %vm1248_vm1, %v1249_v4 }
 0x3b2   :  { %1167 = vmatprep.subr.bf16.mxu1 %v1247_v0 }
 0x3b5   :  { %1169 = vmatpush3.bf16.msra.mxu1 %v1311_v9 }
 0x3b6   :  { %1176 = vmatprep.subr.bf16.mxu1 %v1247_v0 }
 0x483   :  { %v227_v34 = vpop.f32.mrb[0].mxu1 }
 0x484   :  { %v238_v35 = vadd.f32 %v227_v34, %v1327_v11  ;;  %v1079_v36 = vpop.f32.mrb[1].mxu1  ;;  %v231_v38 = vadd.f32 %v990_v37, %v227_v34 }
 0x486   :  { %240 = vrot.lane.b32.xlu1 %v238_v35, %s1250_s30  ;;  %v992_v39 = vmul.f32 -1.442695, %v231_v38 }
 0x488   :  { %1205 = vpow2.f32 %v992_v39 }
 0x492   :  { %v1206_v40 = vpop.eup %1205 }
 0x493   :  { %v235_v41 = vadd.f32 1.0, %v1206_v40 }
 0x495   :  { %1207 = vrcp.f32 %v235_v41 }
 0x49f   :  { %v1208_v42 = vpop.eup %1207 }
 0x4f8   :  { %v241_v43 = vpop.permute.xlu1 %240 }
 0x4f9   :  { %v243_v44 = vmul.f32 %v1208_v42, %v241_v43 }
 0x4fb   :  { %245 = vrot.lane.b32.xlu0 %v243_v44, %s1250_s30  ;;  %v1002_v44 = vld [vmem:[%s1491_s0 + $0x20] sm:$0xff] }
 0x56d   :  { %v246_v45 = vpop.permute.xlu0 %245 }
 0x56e   :  { %v248_v46 = vadd.f32 %v990_v37, %v246_v45 }
 0x570   :  { %1209 = vtanh.f32 %v248_v46 }
 0x57a   :  { %v1210_v47 = vpop.eup %1209 }
 0x57b   :  { %251 = vrot.lane.b32.xlu1 %v1210_v47, %s1250_s30 }
 0x5ed   :  { %v252_v48 = vpop.permute.xlu1 %251 }
 0x5ee   :  { %v254_v49 = vsub.f32 %v155_v33, %v252_v48 }
 0x5f0   :  { %256 = vrot.lane.b32.xlu0 %v254_v49, %s1251_s3 }
 0x662   :  { %v257_v50 = vpop.permute.xlu0 %256 }
 0x663   :  { %v259_v51 = vmul.f32 %v1208_v42, %v257_v50 }
 0x665   :  { %261 = vrot.lane.b32.xlu1 %v259_v51, %s1251_s3 }
 0x6d7   :  { %v262_v52 = vpop.permute.xlu1 %261 }
 0x6d8   :  { %v264_v53 = vadd.f32 %v1210_v47, %v262_v52 }
 0x6da   :  { %266 = vrot.lane.b32.xlu0 %v264_v53, %s1250_s30 }
 0x74c   :  { %v267_v54 = vpop.permute.xlu0 %266 }
 0x74d   :  { %269 = vst.msk [vmem:[#allocation2] sm:$0xff] %vm24_vm0, %v267_v54  ;;  %993 = vst.msk [vmem:[%s1492_s4 + $0x8] sm:$0xff] %vm24_vm0, %v267_v54 }
 0x754   :  { %v272_v55 = vld [vmem:[#allocation2] sm:$0xff] }
 0x755   :  { %1089 = vmatmul.mubr.msk.f32.vlgmr.msra.gmra.mrb[2].mxu0 %vm24_vm0, %v272_v55 }
 0x756   :  { %1172 = vmatpush3.bf16.msra.mxu0 %v1294_v5  ;;  %1110 = vmatprep.mubr.msk.f32.mxu0 %vm1248_vm1, %v1249_v4 }
 0x757   :  { %1173 = vmatprep.subr.bf16.mxu0 %v1247_v0 }
 0x75a   :  { %1175 = vmatpush3.bf16.msra.mxu0 %v1311_v9 }
 0x75b   :  { %1182 = vmatprep.subr.bf16.mxu0 %v1247_v0 }
 0x828   :  { %v344_v56 = vpop.f32.mrb[2].mxu0 }
 0x829   :  { %v355_v57 = vadd.f32 %v344_v56, %v1327_v11  ;;  %v1090_v58 = vpop.f32.mrb[3].mxu0  ;;  %v348_v60 = vadd.f32 %v994_v59, %v344_v56 }
 0x82b   :  { %357 = vrot.lane.b32.xlu1 %v355_v57, %s1250_s30  ;;  %v996_v61 = vmul.f32 -1.442695, %v348_v60 }
 0x82d   :  { %1211 = vpow2.f32 %v996_v61 }
 0x837   :  { %v1212_v62 = vpop.eup %1211 }
 0x838   :  { %v352_v63 = vadd.f32 1.0, %v1212_v62 }
 0x83a   :  { %1213 = vrcp.f32 %v352_v63 }
 0x844   :  { %v1214_v1 = vpop.eup %1213 }
 0x89d   :  { %v358_v2 = vpop.permute.xlu1 %357 }
 0x89e   :  { %v360_v3 = vmul.f32 %v1214_v1, %v358_v2 }
 0x8a0   :  { %362 = vrot.lane.b32.xlu0 %v360_v3, %s1250_s30  ;;  %v1006_v3 = vld [vmem:[%s1491_s0 + $0x28] sm:$0xff] }
 0x912   :  { %v363_v6 = vpop.permute.xlu0 %362 }
 0x913   :  { %v365_v7 = vadd.f32 %v994_v59, %v363_v6 }
 0x915   :  { %1215 = vtanh.f32 %v365_v7 }
 0x91f   :  { %v1216_v8 = vpop.eup %1215 }
 0x920   :  { %368 = vrot.lane.b32.xlu1 %v1216_v8, %s1250_s30 }
 0x992   :  { %v369_v10 = vpop.permute.xlu1 %368 }
 0x993   :  { %v371_v12 = vsub.f32 %v272_v55, %v369_v10 }
 0x995   :  { %373 = vrot.lane.b32.xlu0 %v371_v12, %s1251_s3 }
 0xa07   :  { %v374_v13 = vpop.permute.xlu0 %373 }
 0xa08   :  { %v376_v14 = vmul.f32 %v1214_v1, %v374_v13 }
 0xa0a   :  { %378 = vrot.lane.b32.xlu1 %v376_v14, %s1251_s3 }
 0xa7c   :  { %v379_v15 = vpop.permute.xlu1 %378 }
 0xa7d   :  { %v381_v16 = vadd.f32 %v1216_v8, %v379_v15 }
 0xa7f   :  { %383 = vrot.lane.b32.xlu0 %v381_v16, %s1250_s30 }
 0xaf1   :  { %v384_v17 = vpop.permute.xlu0 %383 }
 0xaf2   :  { %386 = vst.msk [vmem:[#allocation2] sm:$0xff] %vm24_vm0, %v384_v17  ;;  %997 = vst.msk [vmem:[%s1492_s4 + $0x10] sm:$0xff] %vm24_vm0, %v384_v17 }
 0xaf9   :  { %v389_v18 = vld [vmem:[#allocation2] sm:$0xff] }
 0xafa   :  { %1100 = vmatmul.mubr.msk.f32.vlgmr.msra.gmra.mrb[2].mxu1 %vm24_vm0, %v389_v18 }
 0xafb   :  { %1178 = vmatpush3.bf16.msra.mxu1 %v1294_v5  ;;  %1121 = vmatprep.mubr.msk.f32.mxu1 %vm1248_vm1, %v1249_v4 }
 0xafc   :  { %1179 = vmatprep.subr.bf16.mxu1 %v1247_v0 }
 0xaff   :  { %1181 = vmatpush3.bf16.msra.mxu1 %v1311_v9 }
 0xb00   :  { %1188 = vmatprep.subr.bf16.mxu1 %v1247_v0 }
 0xbcd   :  { %v461_v19 = vpop.f32.mrb[2].mxu1 }
 0xbce   :  { %v472_v20 = vadd.f32 %v461_v19, %v1327_v11  ;;  %v1101_v21 = vpop.f32.mrb[3].mxu1  ;;  %v465_v23 = vadd.f32 %v998_v22, %v461_v19 }
 0xbd0   :  { %474 = vrot.lane.b32.xlu1 %v472_v20, %s1250_s30  ;;  %v1000_v24 = vmul.f32 -1.442695, %v465_v23 }
 0xbd2   :  { %1217 = vpow2.f32 %v1000_v24 }
 0xbdc   :  { %v1218_v25 = vpop.eup %1217 }
 0xbdd   :  { %v469_v26 = vadd.f32 1.0, %v1218_v25  ;;  %v1010_v25 = vld [vmem:[%s1491_s0 + $0x30] sm:$0xff] }
 0xbdf   :  { %1219 = vrcp.f32 %v469_v26 }
 0xbe9   :  { %v1220_v27 = vpop.eup %1219 }
 0xc42   :  { %v475_v28 = vpop.permute.xlu1 %474 }
 0xc43   :  { %v477_v29 = vmul.f32 %v1220_v27, %v475_v28 }
 0xc45   :  { %479 = vrot.lane.b32.xlu0 %v477_v29, %s1250_s30 }
 0xcb7   :  { %v480_v30 = vpop.permute.xlu0 %479 }
 0xcb8   :  { %v482_v31 = vadd.f32 %v998_v22, %v480_v30 }
 0xcba   :  { %1221 = vtanh.f32 %v482_v31 }
 0xcc4   :  { %v1222_v32 = vpop.eup %1221 }
 0xcc5   :  { %485 = vrot.lane.b32.xlu1 %v1222_v32, %s1250_s30 }
 0xd37   :  { %v486_v33 = vpop.permute.xlu1 %485 }
 0xd38   :  { %v488_v34 = vsub.f32 %v389_v18, %v486_v33 }
 0xd3a   :  { %490 = vrot.lane.b32.xlu0 %v488_v34, %s1251_s3 }
 0xdac   :  { %v491_v35 = vpop.permute.xlu0 %490 }
 0xdad   :  { %v493_v36 = vmul.f32 %v1220_v27, %v491_v35 }
 0xdaf   :  { %495 = vrot.lane.b32.xlu1 %v493_v36, %s1251_s3 }
 0xe21   :  { %v496_v37 = vpop.permute.xlu1 %495 }
 0xe22   :  { %v498_v38 = vadd.f32 %v1222_v32, %v496_v37 }
 0xe24   :  { %500 = vrot.lane.b32.xlu0 %v498_v38, %s1250_s30 }
 0xe96   :  { %v501_v39 = vpop.permute.xlu0 %500 }
 0xe97   :  { %503 = vst.msk [vmem:[#allocation2] sm:$0xff] %vm24_vm0, %v501_v39  ;;  %1001 = vst.msk [vmem:[%s1492_s4 + $0x18] sm:$0xff] %vm24_vm0, %v501_v39 }
 0xe9e   :  { %v506_v40 = vld [vmem:[#allocation2] sm:$0xff] }
 0xe9f   :  { %1111 = vmatmul.mubr.msk.f32.vlgmr.msra.gmra.mrb[4].mxu0 %vm24_vm0, %v506_v40 }
 0xea0   :  { %1184 = vmatpush3.bf16.msra.mxu0 %v1294_v5  ;;  %1132 = vmatprep.mubr.msk.f32.mxu0 %vm1248_vm1, %v1249_v4 }
 0xea1   :  { %1185 = vmatprep.subr.bf16.mxu0 %v1247_v0 }
 0xea4   :  { %1187 = vmatpush3.bf16.msra.mxu0 %v1311_v9 }
 0xf72   :  { %v578_v41 = vpop.f32.mrb[4].mxu0 }
 0xf73   :  { %v589_v42 = vadd.f32 %v578_v41, %v1327_v11  ;;  %v1112_v43 = vpop.f32.mrb[5].mxu0  ;;  %v582_v45 = vadd.f32 %v1002_v44, %v578_v41 }
 0xf75   :  { %591 = vrot.lane.b32.xlu1 %v589_v42, %s1250_s30  ;;  %v1004_v46 = vmul.f32 -1.442695, %v582_v45 }
 0xf77   :  { %1223 = vpow2.f32 %v1004_v46 }
 0xf81   :  { %v1224_v47 = vpop.eup %1223 }
 0xf82   :  { %v586_v48 = vadd.f32 1.0, %v1224_v47  ;;  %v1014_v47 = vld [vmem:[%s1491_s0 + $0x38] sm:$0xff] }
 0xf84   :  { %1225 = vrcp.f32 %v586_v48 }
 0xf8e   :  { %v1226_v49 = vpop.eup %1225 }
 0xfe7   :  { %v592_v50 = vpop.permute.xlu1 %591 }
 0xfe8   :  { %v594_v51 = vmul.f32 %v1226_v49, %v592_v50 }
 0xfea   :  { %596 = vrot.lane.b32.xlu0 %v594_v51, %s1250_s30 }
0x105c   :  { %v597_v52 = vpop.permute.xlu0 %596 }
0x105d   :  { %v599_v53 = vadd.f32 %v1002_v44, %v597_v52 }
0x105f   :  { %1227 = vtanh.f32 %v599_v53 }
0x1069   :  { %v1228_v54 = vpop.eup %1227 }
0x106a   :  { %602 = vrot.lane.b32.xlu1 %v1228_v54, %s1250_s30 }
0x10dc   :  { %v603_v55 = vpop.permute.xlu1 %602 }
0x10dd   :  { %v605_v56 = vsub.f32 %v506_v40, %v603_v55 }
0x10df   :  { %607 = vrot.lane.b32.xlu0 %v605_v56, %s1251_s3 }
0x1151   :  { %v608_v57 = vpop.permute.xlu0 %607 }
0x1152   :  { %v610_v58 = vmul.f32 %v1226_v49, %v608_v57 }
0x1154   :  { %612 = vrot.lane.b32.xlu1 %v610_v58, %s1251_s3 }
0x11c6   :  { %v613_v59 = vpop.permute.xlu1 %612 }
0x11c7   :  { %v615_v60 = vadd.f32 %v1228_v54, %v613_v59 }
0x11c9   :  { %617 = vrot.lane.b32.xlu0 %v615_v60, %s1250_s30 }
0x123b   :  { %v618_v61 = vpop.permute.xlu0 %617 }
0x123c   :  { %620 = vst.msk [vmem:[#allocation2] sm:$0xff] %vm24_vm0, %v618_v61  ;;  %1005 = vst.msk [vmem:[%s1492_s4 + $0x20] sm:$0xff] %vm24_vm0, %v618_v61 }
0x1243   :  { %v623_v62 = vld [vmem:[#allocation2] sm:$0xff] }
0x1244   :  { %1122 = vmatmul.mubr.msk.f32.vlgmr.msra.gmra.mrb[4].mxu1 %vm24_vm0, %v623_v62 }
0x1245   :  { %1190 = vmatpush3.bf16.msra.mxu1 %v1294_v5  ;;  %1143 = vmatprep.mubr.msk.f32.mxu1 %vm1248_vm1, %v1249_v4 }
0x1246   :  { %1191 = vmatprep.subr.bf16.mxu1 %v1247_v0 }
0x1249   :  { %1193 = vmatpush3.bf16.msra.mxu1 %v1311_v9 }
0x1317   :  { %v695_v63 = vpop.f32.mrb[4].mxu1 }
0x1318   :  { %v706_v1 = vadd.f32 %v695_v63, %v1327_v11  ;;  %v1123_v2 = vpop.f32.mrb[5].mxu1  ;;  %v699_v6 = vadd.f32 %v1006_v3, %v695_v63 }
0x131a   :  { %708 = vrot.lane.b32.xlu1 %v706_v1, %s1250_s30  ;;  %v1008_v7 = vmul.f32 -1.442695, %v699_v6 }
0x131c   :  { %1229 = vpow2.f32 %v1008_v7 }
0x1326   :  { %v1230_v5 = vpop.eup %1229 }
0x1327   :  { %v703_v8 = vadd.f32 1.0, %v1230_v5 }
0x1329   :  { %1231 = vrcp.f32 %v703_v8 }
0x1333   :  { %v1232_v4 = vpop.eup %1231 }
0x138c   :  { %v709_v0 = vpop.permute.xlu1 %708 }
0x138d   :  { %v711_v10 = vmul.f32 %v1232_v4, %v709_v0 }
0x138f   :  { %713 = vrot.lane.b32.xlu0 %v711_v10, %s1250_s30 }
0x1401   :  { %v714_v9 = vpop.permute.xlu0 %713 }
0x1402   :  { %v716_v12 = vadd.f32 %v1006_v3, %v714_v9 }
0x1404   :  { %1233 = vtanh.f32 %v716_v12 }
0x140e   :  { %v1234_v13 = vpop.eup %1233 }
0x140f   :  { %719 = vrot.lane.b32.xlu1 %v1234_v13, %s1250_s30 }
0x1481   :  { %v720_v14 = vpop.permute.xlu1 %719 }
0x1482   :  { %v722_v15 = vsub.f32 %v623_v62, %v720_v14 }
0x1484   :  { %724 = vrot.lane.b32.xlu0 %v722_v15, %s1251_s3 }
0x14f6   :  { %v725_v16 = vpop.permute.xlu0 %724 }
0x14f7   :  { %v727_v17 = vmul.f32 %v1232_v4, %v725_v16 }
0x14f9   :  { %729 = vrot.lane.b32.xlu1 %v727_v17, %s1251_s3 }
0x156b   :  { %v730_v18 = vpop.permute.xlu1 %729 }
0x156c   :  { %v732_v19 = vadd.f32 %v1234_v13, %v730_v18 }
0x156e   :  { %734 = vrot.lane.b32.xlu0 %v732_v19, %s1250_s30 }
0x15e0   :  { %v735_v20 = vpop.permute.xlu0 %734 }
0x15e1   :  { %737 = vst.msk [vmem:[#allocation2] sm:$0xff] %vm24_vm0, %v735_v20  ;;  %1009 = vst.msk [vmem:[%s1492_s4 + $0x28] sm:$0xff] %vm24_vm0, %v735_v20 }
0x15e8   :  { %v740_v21 = vld [vmem:[#allocation2] sm:$0xff] }
0x15e9   :  { %1133 = vmatmul.mubr.msk.f32.vlgmr.msra.gmra.mrb[6].mxu0 %vm24_vm0, %v740_v21 }
0x16bc   :  { %v812_v22 = vpop.f32.mrb[6].mxu0 }
0x16bd   :  { %v823_v23 = vadd.f32 %v812_v22, %v1327_v11  ;;  %v1134_v24 = vpop.f32.mrb[7].mxu0  ;;  %v816_v26 = vadd.f32 %v1010_v25, %v812_v22 }
0x16bf   :  { %825 = vrot.lane.b32.xlu1 %v823_v23, %s1250_s30  ;;  %v1012_v27 = vmul.f32 -1.442695, %v816_v26 }
0x16c1   :  { %1235 = vpow2.f32 %v1012_v27 }
0x16cb   :  { %v1236_v28 = vpop.eup %1235 }
0x16cc   :  { %v820_v29 = vadd.f32 1.0, %v1236_v28 }
0x16ce   :  { %1237 = vrcp.f32 %v820_v29 }
0x16d8   :  { %v1238_v30 = vpop.eup %1237 }
0x1731   :  { %v826_v31 = vpop.permute.xlu1 %825 }
0x1732   :  { %v828_v32 = vmul.f32 %v1238_v30, %v826_v31 }
0x1734   :  { %830 = vrot.lane.b32.xlu0 %v828_v32, %s1250_s30 }
0x17a6   :  { %v831_v33 = vpop.permute.xlu0 %830 }
0x17a7   :  { %v833_v34 = vadd.f32 %v1010_v25, %v831_v33 }
0x17a9   :  { %1239 = vtanh.f32 %v833_v34 }
0x17b3   :  { %v1240_v35 = vpop.eup %1239 }
0x17b4   :  { %836 = vrot.lane.b32.xlu1 %v1240_v35, %s1250_s30 }
0x1826   :  { %v837_v36 = vpop.permute.xlu1 %836 }
0x1827   :  { %v839_v37 = vsub.f32 %v740_v21, %v837_v36 }
0x1829   :  { %841 = vrot.lane.b32.xlu0 %v839_v37, %s1251_s3 }
0x189b   :  { %v842_v38 = vpop.permute.xlu0 %841 }
0x189c   :  { %v844_v39 = vmul.f32 %v1238_v30, %v842_v38 }
0x189e   :  { %846 = vrot.lane.b32.xlu1 %v844_v39, %s1251_s3 }
0x1910   :  { %v847_v40 = vpop.permute.xlu1 %846 }
0x1911   :  { %v849_v41 = vadd.f32 %v1240_v35, %v847_v40 }
0x1913   :  { %851 = vrot.lane.b32.xlu0 %v849_v41, %s1250_s30 }
0x1985   :  { %v852_v42 = vpop.permute.xlu0 %851 }
0x1986   :  { %854 = vst.msk [vmem:[#allocation2] sm:$0xff] %vm24_vm0, %v852_v42  ;;  %1013 = vst.msk [vmem:[%s1492_s4 + $0x30] sm:$0xff] %vm24_vm0, %v852_v42 }
0x198d   :  { %v857_v43 = vld [vmem:[#allocation2] sm:$0xff] }
0x198e   :  { %1144 = vmatmul.mubr.msk.f32.vlgmr.msra.gmra.mrb[6].mxu1 %vm24_vm0, %v857_v43 }
0x1a61   :  { %v929_v44 = vpop.f32.mrb[6].mxu1 }
0x1a62   :  { %v940_v45 = vadd.f32 %v929_v44, %v1327_v11  ;;  %v1145_v46 = vpop.f32.mrb[7].mxu1  ;;  %v933_v48 = vadd.f32 %v1014_v47, %v929_v44 }
0x1a64   :  { %942 = vrot.lane.b32.xlu1 %v940_v45, %s1250_s30  ;;  %v1016_v49 = vmul.f32 -1.442695, %v933_v48 }
0x1a66   :  { %1241 = vpow2.f32 %v1016_v49 }
0x1a70   :  { %v1242_v50 = vpop.eup %1241 }
0x1a71   :  { %v937_v51 = vadd.f32 1.0, %v1242_v50 }
0x1a73   :  { %1243 = vrcp.f32 %v937_v51 }
0x1a7d   :  { %v1244_v52 = vpop.eup %1243 }
0x1ad6   :  { %v943_v53 = vpop.permute.xlu1 %942 }
0x1ad7   :  { %v945_v54 = vmul.f32 %v1244_v52, %v943_v53 }
0x1ad9   :  { %947 = vrot.lane.b32.xlu0 %v945_v54, %s1250_s30 }
0x1b4b   :  { %v948_v55 = vpop.permute.xlu0 %947 }
0x1b4c   :  { %v950_v11 = vadd.f32 %v1014_v47, %v948_v55 }
0x1b4e   :  { %1245 = vtanh.f32 %v950_v11 }
0x1b58   :  { %v1246_v56 = vpop.eup %1245 }
0x1b59   :  { %953 = vrot.lane.b32.xlu1 %v1246_v56, %s1250_s30 }
0x1bcb   :  { %v954_v57 = vpop.permute.xlu1 %953 }
0x1bcc   :  { %v956_v58 = vsub.f32 %v857_v43, %v954_v57 }
0x1bce   :  { %958 = vrot.lane.b32.xlu0 %v956_v58, %s1251_s3 }
0x1c40   :  { %v959_v59 = vpop.permute.xlu0 %958 }
0x1c41   :  { %v961_v60 = vmul.f32 %v1244_v52, %v959_v59 }
0x1c43   :  { %963 = vrot.lane.b32.xlu1 %v961_v60, %s1251_s3 }
0x1cb5   :  { %v964_v61 = vpop.permute.xlu1 %963 }
0x1cb6   :  { %v966_v62 = vadd.f32 %v1246_v56, %v964_v61 }
0x1cb8   :  { %968 = vrot.lane.b32.xlu0 %v966_v62, %s1250_s30 }
0x1d2a   :  { %v969_v63 = vpop.permute.xlu0 %968 }
0x1d2b   :  { %971 = vst.msk [vmem:[#allocation2] sm:$0xff] %vm24_vm0, %v969_v63  ;;  %1017 = vst.msk [vmem:[%s1492_s4 + $0x38] sm:$0xff] %vm24_vm0, %v969_v63 }
0x1d32   :  { %v977_v1 = vld [vmem:[#allocation2] sm:$0xff] }
0x1d33   :  { %978 = vst.msk [vmem:[%s1493_s5] sm:$0xff] %vm24_vm0, %v977_v1 }

</bundles_post_ra>
